<compile_context>
chip_gen: v5e
topology: v5e:2x2
jax: 0.10.0
libtpu: 0.0.40
codegen_flags: <defaults>
</compile_context>

<pallas_src>
import functools
import math

import jax
import jax.numpy as jnp
import numpy as np
from jax.experimental import pallas as pl
from jax.experimental.pallas import tpu as pltpu

EPS = 1e-6
_SINGLE_BUFFER_OK = True  # flips to False if this jax build rejects pl.Buffered(1)


def _vmem_capacity_bytes():
    try:
        cap = getattr(pltpu.get_tpu_info(), "vmem_capacity_bytes", None)
        if cap:
            return int(cap)
    except Exception:
        pass
    return 128 * 1024 * 1024  # v5e/v6e default


def _layernorm(z, gamma, beta, d):
    # alpha*(x-mean)/(std+eps)+bias, unbiased std.  Per-row reciprocal (EUP slot) +
    # broadcast multiply instead of a per-element divide (review item).
    mean = jnp.mean(z, axis=-1, keepdims=True)
    var = jnp.sum((z - mean) ** 2, axis=-1, keepdims=True) / (d - 1)
    inv = pl.reciprocal(jnp.sqrt(var) + EPS)  # exact
    return gamma * ((z - mean) * inv) + beta


def _resident_spec(shape, single_buffer):
    # Constant index map: block == full array, fetched once, VMEM-resident across the grid.
    nd = len(shape)
    idx = lambda b, q, _nd=nd: (0,) * _nd
    if single_buffer:
        return pl.BlockSpec(shape, idx, pipeline_mode=pl.Buffered(buffer_count=1))
    return pl.BlockSpec(shape, idx)


# --------------------------------------------------------------------------------------
# Stage 1: LN + fused QKV projection, head-major output
# --------------------------------------------------------------------------------------
def qkv_prepass_kernel(x_ref, g1_ref, beta1_ref, wqkv_ref, bqkv_ref,
                       q_ref, k_ref, v_ref, *, num_heads):
    ts, D = x_ref.shape[1], x_ref.shape[2]
    d_k = D // num_heads
    xn = _layernorm(x_ref[0], g1_ref[...], beta1_ref[...], D)
    qkv = jnp.dot(xn.astype(jnp.bfloat16), wqkv_ref[...],
                  preferred_element_type=jnp.float32) + bqkv_ref[...]      # (ts, 3D) f32
    # Head split once per sequence tile (off the attention kernel's critical path).
    # TODO(synk): pad d_k to 128 for lane-aligned stores at production head sizes.
    for h in range(num_heads):
        lo = h * d_k
        q_ref[0, h] = qkv[:, lo:lo + d_k].astype(jnp.bfloat16)            # Wq/bq pre-scaled
        k_ref[0, h] = qkv[:, D + lo:D + lo + d_k].astype(jnp.bfloat16)
        v_ref[0, h] = qkv[:, 2 * D + lo:2 * D + lo + d_k].astype(jnp.bfloat16)


def _qkv_prepass_call(x, prep, *, num_heads, single_buffer, ts_max=256):
    B, S, D = x.shape
    H = num_heads
    d_k = D // H
    ts = min(S, ts_max)
    while S % ts:
        ts -= 1
    ns = S // ts

    weights = [prep['g1'], prep['beta1'], prep['wqkv'], prep['bqkv']]
    in_specs = ([pl.BlockSpec((1, ts, D), lambda b, s: (b, s, 0))]
                + [_resident_spec(w.shape, single_buffer) for w in weights])
    out_specs = [pl.BlockSpec((1, H, ts, d_k), lambda b, s: (b, 0, s, 0))] * 3
    out_shape = [jax.ShapeDtypeStruct((B, H, S, d_k), jnp.bfloat16)] * 3

    wbytes = int(sum(int(np.prod(w.shape)) * w.dtype.itemsize for w in weights))
    flops = int(2 * B * S * D * 3 * D)
    bytes_accessed = int(B * S * D * 4 + 3 * B * S * D * 2 + wbytes)

    vmem_cap = _vmem_capacity_bytes()
    est = ((1 if single_buffer else 2) * wbytes + 2 * ts * D * 4
           + 2 * 3 * H * ts * d_k * 2 + 6 * ts * D * 4 + (2 << 20))
    vmem_limit = int(min(max(est, 16 << 20), int(0.8 * vmem_cap)))

    kernel = functools.partial(qkv_prepass_kernel, num_heads=H)
    return pl.pallas_call(
        kernel,
        out_shape=out_shape,
        grid=(B, ns),
        in_specs=in_specs,
        out_specs=out_specs,
        compiler_params=pltpu.CompilerParams(
            dimension_semantics=("parallel", "parallel"),
            vmem_limit_bytes=vmem_limit),
        cost_estimate=pl.CostEstimate(flops=flops, transcendentals=0,
                                      bytes_accessed=bytes_accessed),
    )(x, *weights)


# --------------------------------------------------------------------------------------
# Stage 2: attention + output projection + FFN + residuals (+ optional final LN)
# --------------------------------------------------------------------------------------
def encoder_block_kernel(x_ref, bias_ref, q_ref, k_ref, v_ref,
                         wo_ref, bo_ref, w1_ref, b1_ref, w2_ref, b2_ref,
                         g2_ref, beta2_ref, gf_ref, betaf_ref,
                         o_ref, ctx_scr, *, apply_final_norm):
    tq, D = x_ref.shape[1], x_ref.shape[2]
    H, d_k = q_ref.shape[1], q_ref.shape[3]

    x_tile = x_ref[0]                                                   # (tq, D) f32
    qh = q_ref[0]                                                       # (H, tq, d_k) bf16
    kh = k_ref[0]                                                       # (H, S, d_k)  bf16
    vh = v_ref[0]                                                       # (H, S, d_k)  bf16

    # ---- sublayer 1: multi-head self-attention (heads batched, additive mask bias) ----
    scores = jnp.einsum('hqd,hkd->hqk', qh, kh,
                        preferred_element_type=jnp.float32)             # (H, tq, S) f32
    scores = scores + bias_ref[0]                                       # (1, S) broadcast
    m = jnp.max(scores, axis=-1, keepdims=True)
    e = jnp.exp(scores - m)
    p = e * pl.reciprocal(jnp.sum(e, axis=-1, keepdims=True), approx=True)
    ctx = jnp.einsum('hqk,hkd->hqd', p.astype(jnp.bfloat16), vh,
                     preferred_element_type=jnp.float32)                # (H, tq, d_k) f32

    # Head-merge into (tq, D) via static column-offset stores, then ONE D-contraction matmul
    # on the MXU (replaces the per-head d_k-contraction + cross-head sum).
    for h in range(H):
        ctx_scr[:, h * d_k:(h + 1) * d_k] = ctx[h].astype(jnp.bfloat16)
    attn = jnp.dot(ctx_scr[...], wo_ref[...],
                   preferred_element_type=jnp.float32) + bo_ref[...]
    x1 = x_tile + attn                                                  # dropout = identity

    # ---- sublayer 2: pre-norm feed-forward + residual ----
    xn2 = _layernorm(x1, g2_ref[...], beta2_ref[...], D)
    hdn = jnp.maximum(
        jnp.dot(xn2.astype(jnp.bfloat16), w1_ref[...],
                preferred_element_type=jnp.float32) + b1_ref[...], 0.0)
    ff = jnp.dot(hdn.astype(jnp.bfloat16), w2_ref[...],
                 preferred_element_type=jnp.float32) + b2_ref[...]
    y = x1 + ff

    if apply_final_norm:  # static: Encoder.norm fused into the last layer's kernel
        y = _layernorm(y, gf_ref[...], betaf_ref[...], D)
    o_ref[0] = y


def _choose_tq(S, H, vmem_cap, tq_max=256):
    # f32 softmax temporaries are ~3 * H * tq * S * 4 bytes; keep them within ~30% of VMEM
    # (v7x's 64 MiB forces smaller tq at large H*S; v5e/v6e keep the bigger tile).
    cap = int((0.3 * vmem_cap) // max(12 * H * S, 1))
    tq = min(S, tq_max, max(8, cap))
    while S % tq:
        tq -= 1  # TODO(synk): pad S to a multiple of the tile for production shapes.
    return tq


def _encoder_block_call(x, mask_bias, q_hm, k_hm, v_hm, prep, final_gamma, final_beta,
                        *, num_heads, apply_final_norm, single_buffer, tq_max=256):
    B, S, D = x.shape
    H = num_heads
    d_k = D // H
    d_ff = prep['w1'].shape[1]
    vmem_cap = _vmem_capacity_bytes()
    tq = _choose_tq(S, H, vmem_cap, tq_max)
    nq = S // tq

    weights = [prep['wo'], prep['bo'], prep['w1'], prep['b1'], prep['w2'], prep['b2'],
               prep['g2'], prep['beta2'], final_gamma, final_beta]

    in_specs = ([pl.BlockSpec((1, tq, D), lambda b, q: (b, q, 0)),          # residual tile
                 pl.BlockSpec((1, 1, S), lambda b, q: (b, 0, 0)),           # mask bias
                 pl.BlockSpec((1, H, tq, d_k), lambda b, q: (b, 0, q, 0)),  # Q tile
                 pl.BlockSpec((1, H, S, d_k), lambda b, q: (b, 0, 0, 0)),   # K (per-b)
                 pl.BlockSpec((1, H, S, d_k), lambda b, q: (b, 0, 0, 0))]   # V (per-b)
                + [_resident_spec(w.shape, single_buffer) for w in weights])

    wbytes = int(sum(int(np.prod(w.shape)) * w.dtype.itemsize for w in weights))
    flops = int(4 * B * S * S * D + 2 * B * S * D * D + 4 * B * S * D * d_ff)
    transcendentals = int(B * H * S * S)
    bytes_accessed = int(wbytes + 2 * B * S * D * 4 + 3 * B * S * D * 2 + B * S * 4)

    est = ((1 if single_buffer else 2) * wbytes
           + 2 * 2 * H * S * d_k * 2            # K, V (double-buffered)
           + 2 * H * tq * d_k * 2               # Q tiles
           + 4 * tq * D * 4 + 2 * S * 4         # x in / out + bias
           + 3 * H * tq * S * 4                 # scores / exp / probs
           + tq * d_ff * 4 + 6 * tq * D * 4 + tq * D * 2
           + (2 << 20))
    vmem_limit = int(min(max(est, 16 << 20), int(0.8 * vmem_cap)))

    kernel = functools.partial(encoder_block_kernel, apply_final_norm=apply_final_norm)
    return pl.pallas_call(
        kernel,
        out_shape=jax.ShapeDtypeStruct((B, S, D), jnp.float32),
        grid=(B, nq),
        in_specs=in_specs,
        out_specs=pl.BlockSpec((1, tq, D), lambda b, q: (b, q, 0)),
        scratch_shapes=[pltpu.VMEM((tq, D), jnp.bfloat16)],
        compiler_params=pltpu.CompilerParams(
            dimension_semantics=("parallel", "parallel"),
            vmem_limit_bytes=vmem_limit),
        cost_estimate=pl.CostEstimate(flops=flops, transcendentals=transcendentals,
                                      bytes_accessed=bytes_accessed),
    )(x, mask_bias, q_hm, k_hm, v_hm, *weights)


# --------------------------------------------------------------------------------------
# Driver
# --------------------------------------------------------------------------------------
def _prepare_layer(p, num_heads):
    """Fuse QKV, fold 1/sqrt(d_k) into Wq/bq, cast matmul weights to bf16."""
    D = p['wq'].shape[0]
    d_k = D // num_heads
    scale = 1.0 / math.sqrt(d_k)
    return {
        'wqkv': jnp.concatenate([p['wq'] * scale, p['wk'], p['wv']], axis=1).astype(jnp.bfloat16),
        'bqkv': jnp.concatenate([p['bq'] * scale, p['bk'], p['bv']], axis=1).astype(jnp.float32),
        'wo': p['wo'].astype(jnp.bfloat16), 'bo': p['bo'].astype(jnp.float32),
        'w1': p['w1'].astype(jnp.bfloat16), 'b1': p['b1'].astype(jnp.float32),
        'w2': p['w2'].astype(jnp.bfloat16), 'b2': p['b2'].astype(jnp.float32),
        'g1': p['g1'].astype(jnp.float32), 'beta1': p['beta1'].astype(jnp.float32),
        'g2': p['g2'].astype(jnp.float32), 'beta2': p['beta2'].astype(jnp.float32),
    }


def _with_single_buffer_fallback(fn, *args, **kwargs):
    global _SINGLE_BUFFER_OK
    if _SINGLE_BUFFER_OK:
        try:
            return jax.block_until_ready(fn(*args, single_buffer=True, **kwargs))
        except Exception:
            _SINGLE_BUFFER_OK = False  # this build rejects Buffered(1); use default buffering
    return jax.block_until_ready(fn(*args, single_buffer=False, **kwargs))


def encoder_forward(x, src_mask, layer_params, final_gamma, final_beta, *, num_heads):
    """Encoder.forward: apply each block; final LayerNorm fused into the last block."""
    assert x.shape[-1] % num_heads == 0
    # Additive mask bias precomputed once (drops the per-tile compare/select).  NOTE: rows
    # whose keys are ALL masked differ slightly from an exact -1e9 fill; padding masks never
    # hit that case.
    mask_bias = jnp.where(src_mask == 0.0, jnp.float32(-1e9), jnp.float32(0.0))
    n = len(layer_params)
    for i, p in enumerate(layer_params):
        prep = _prepare_layer(p, num_heads)
        q_hm, k_hm, v_hm = _with_single_buffer_fallback(
            _qkv_prepass_call, x, prep, num_heads=num_heads)
        x = _with_single_buffer_fallback(
            _encoder_block_call, x, mask_bias, q_hm, k_hm, v_hm, prep,
            final_gamma, final_beta, num_heads=num_heads,
            apply_final_norm=(i == n - 1))
    # TODO(synk): for v5e, keep the inter-layer residual stream in bf16 (or fuse the layer
    #             loop into one pallas_call with a layer grid axis) to cut HBM traffic.
    return x


def reference_encoder(x, src_mask, layer_params, final_gamma, final_beta, *, num_heads):
    """Plain-JAX f32 reference with identical math (for verification)."""
    B, S, D = x.shape
    d_k = D // num_heads

    def ln(z, g, b):
        mean = jnp.mean(z, axis=-1, keepdims=True)
        var = jnp.sum((z - mean) ** 2, axis=-1, keepdims=True) / (D - 1)
        return g * (z - mean) / (jnp.sqrt(var) + EPS) + b

    for p in layer_params:
        xn = ln(x, p['g1'], p['beta1'])
        q = (xn @ p['wq'] + p['bq']).reshape(B, S, num_heads, d_k).transpose(0, 2, 1, 3)
        k = (xn @ p['wk'] + p['bk']).reshape(B, S, num_heads, d_k).transpose(0, 2, 1, 3)
        v = (xn @ p['wv'] + p['bv']).reshape(B, S, num_heads, d_k).transpose(0, 2, 1, 3)
        scores = jnp.einsum('bhqd,bhkd->bhqk', q, k) / jnp.sqrt(jnp.float32(d_k))
        scores = jnp.where(src_mask[:, :, None, :] == 0.0, -1e9, scores)
        probs = jax.nn.softmax(scores, axis=-1)
        attn = jnp.einsum('bhqk,bhkd->bhqd', probs, v)
        attn = attn.transpose(0, 2, 1, 3).reshape(B, S, D)
        x = x + attn @ p['wo'] + p['bo']
        xn2 = ln(x, p['g2'], p['beta2'])
        x = x + jnp.maximum(xn2 @ p['w1'] + p['b1'], 0.0) @ p['w2'] + p['b2']
    return ln(x, final_gamma, final_beta)


def init_params(key, d_model, d_ff):
    ks = jax.random.split(key, 12)
    n = lambda k, shape: (0.02 * jax.random.normal(k, shape)).astype(jnp.float32)
    return {
        'wq': n(ks[0], (d_model, d_model)), 'bq': n(ks[1], (1, d_model)),
        'wk': n(ks[2], (d_model, d_model)), 'bk': n(ks[3], (1, d_model)),
        'wv': n(ks[4], (d_model, d_model)), 'bv': n(ks[5], (1, d_model)),
        'wo': n(ks[6], (d_model, d_model)), 'bo': n(ks[7], (1, d_model)),
        'w1': n(ks[8], (d_model, d_ff)),    'b1': n(ks[9], (1, d_ff)),
        'w2': n(ks[10], (d_ff, d_model)),   'b2': n(ks[11], (1, d_model)),
        'g1': jnp.ones((1, d_model), jnp.float32),
        'beta1': jnp.zeros((1, d_model), jnp.float32),
        'g2': jnp.ones((1, d_model), jnp.float32),
        'beta2': jnp.zeros((1, d_model), jnp.float32),
    }


if __name__ == "__main__":
    B, S, D, H, D_FF, N_LAYERS = 2, 8, 32, 4, 64, 2
    key = jax.random.PRNGKey(0)
    k_x, *k_layers = jax.random.split(key, 1 + N_LAYERS)

    x = jax.random.normal(k_x, (B, S, D), dtype=jnp.float32)
    # src_mask: 1 = attend, 0 = masked (padding); mask out the last 2 keys of batch 1.
    src_mask = jnp.ones((B, 1, S), dtype=jnp.float32).at[1, 0, 6:].set(0.0)

    layer_params = [init_params(k, D, D_FF) for k in k_layers]
    final_gamma = jnp.ones((1, D), jnp.float32)
    final_beta = jnp.zeros((1, D), jnp.float32)

    out = encoder_forward(x, src_mask, layer_params, final_gamma, final_beta, num_heads=H)
    out = jax.block_until_ready(out)

    ref = reference_encoder(x, src_mask, layer_params, final_gamma, final_beta, num_heads=H)
    np.testing.assert_allclose(np.asarray(out), np.asarray(ref), rtol=2e-2, atol=2e-2)

    print("KERNEL_OK")
</pallas_src>

<mosaic_0001>
module attributes {stable_mosaic.version = 11 : i64} {
  func.func @qkv_prepass_kernel(%arg0: i32, %arg1: i32, %arg2: memref<1x8x32xf32, #tpu.memory_space<vmem>>, %arg3: memref<1x32xf32, #tpu.memory_space<vmem>>, %arg4: memref<1x32xf32, #tpu.memory_space<vmem>>, %arg5: memref<32x96xbf16, #tpu.memory_space<vmem>>, %arg6: memref<1x96xf32, #tpu.memory_space<vmem>>, %arg7: memref<1x4x8x8xbf16, #tpu.memory_space<vmem>>, %arg8: memref<1x4x8x8xbf16, #tpu.memory_space<vmem>>, %arg9: memref<1x4x8x8xbf16, #tpu.memory_space<vmem>>) attributes {dimension_semantics = [#tpu.dimension_semantics<parallel>, #tpu.dimension_semantics<parallel>], iteration_bounds = array<i64: 2, 1>, scalar_prefetch = 0 : i64, scratch_operands = 0 : i64, tpu.core_type = #tpu.core_type<tc>, window_params = [{transform_indices = @transform_0, window_bounds = array<i64: 1, 8, 32>}, {pipeline_mode = #tpu.pipeline_mode<synchronous>, transform_indices = @transform_1, window_bounds = array<i64: 1, 32>}, {pipeline_mode = #tpu.pipeline_mode<synchronous>, transform_indices = @transform_2, window_bounds = array<i64: 1, 32>}, {pipeline_mode = #tpu.pipeline_mode<synchronous>, transform_indices = @transform_3, window_bounds = array<i64: 32, 96>}, {pipeline_mode = #tpu.pipeline_mode<synchronous>, transform_indices = @transform_4, window_bounds = array<i64: 1, 96>}, {transform_indices = @transform_5, window_bounds = array<i64: 1, 4, 8, 8>}, {transform_indices = @transform_6, window_bounds = array<i64: 1, 4, 8, 8>}, {transform_indices = @transform_7, window_bounds = array<i64: 1, 4, 8, 8>}]} {
    %c0 = arith.constant 0 : index
    %c0_0 = arith.constant 0 : index
    %c0_1 = arith.constant 0 : index
    %0 = vector.load %arg2[%c0, %c0_0, %c0_1] : memref<1x8x32xf32, #tpu.memory_space<vmem>>, vector<1x8x32xf32>
    %1 = vector.shape_cast %0 : vector<1x8x32xf32> to vector<8x32xf32>
    %c0_2 = arith.constant 0 : index
    %c0_3 = arith.constant 0 : index
    %2 = vector.load %arg3[%c0_2, %c0_3] : memref<1x32xf32, #tpu.memory_space<vmem>>, vector<1x32xf32>
    %c0_4 = arith.constant 0 : index
    %c0_5 = arith.constant 0 : index
    %3 = vector.load %arg4[%c0_4, %c0_5] : memref<1x32xf32, #tpu.memory_space<vmem>>, vector<1x32xf32>
    %cst = arith.constant dense<0.000000e+00> : vector<8xf32>
    %4 = vector.multi_reduction <add>, %1, %cst [1] : vector<8x32xf32> to vector<8xf32>
    %5 = vector.shape_cast %4 : vector<8xf32> to vector<8x1xf32>
    %cst_6 = arith.constant 3.200000e+01 : f32
    %6 = vector.broadcast %cst_6 : f32 to vector<8x1xf32>
    %7 = arith.divf %5, %6 : vector<8x1xf32>
    %8 = vector.broadcast %7 : vector<8x1xf32> to vector<8x32xf32>
    %9 = arith.subf %1, %8 : vector<8x32xf32>
    %10 = arith.mulf %9, %9 : vector<8x32xf32>
    %cst_7 = arith.constant dense<0.000000e+00> : vector<8xf32>
    %11 = vector.multi_reduction <add>, %10, %cst_7 [1] : vector<8x32xf32> to vector<8xf32>
    %12 = vector.shape_cast %11 : vector<8xf32> to vector<8x1xf32>
    %cst_8 = arith.constant 3.100000e+01 : f32
    %13 = vector.broadcast %cst_8 : f32 to vector<8x1xf32>
    %14 = arith.divf %12, %13 : vector<8x1xf32>
    %15 = math.sqrt %14 : vector<8x1xf32>
    %cst_9 = arith.constant 9.99999997E-7 : f32
    %16 = vector.broadcast %cst_9 : f32 to vector<8x1xf32>
    %17 = arith.addf %15, %16 : vector<8x1xf32>
    %18 = tpu.reciprocal %17 : vector<8x1xf32> -> vector<8x1xf32>
    %19 = vector.broadcast %7 : vector<8x1xf32> to vector<8x32xf32>
    %20 = arith.subf %1, %19 : vector<8x32xf32>
    %21 = vector.broadcast %18 : vector<8x1xf32> to vector<8x32xf32>
    %22 = arith.mulf %20, %21 : vector<8x32xf32>
    %23 = vector.broadcast %2 : vector<1x32xf32> to vector<8x32xf32>
    %24 = arith.mulf %23, %22 : vector<8x32xf32>
    %25 = vector.broadcast %3 : vector<1x32xf32> to vector<8x32xf32>
    %26 = arith.addf %24, %25 : vector<8x32xf32>
    %27 = arith.truncf %26 : vector<8x32xf32> to vector<8x32xbf16>
    %c0_10 = arith.constant 0 : index
    %c0_11 = arith.constant 0 : index
    %28 = vector.load %arg5[%c0_10, %c0_11] : memref<32x96xbf16, #tpu.memory_space<vmem>>, vector<32x96xbf16>
    %cst_12 = arith.constant dense<0.000000e+00> : vector<8x96xf32>
    %29 = tpu.matmul %27, %28, %cst_12 {dimension_numbers = #tpu.dot_dimension_numbers<[1], [0], [0], [1], [0, 0, 1, 1], [], []>} : vector<8x32xbf16>, vector<32x96xbf16>, vector<8x96xf32> -> vector<8x96xf32>
    %c0_13 = arith.constant 0 : index
    %c0_14 = arith.constant 0 : index
    %30 = vector.load %arg6[%c0_13, %c0_14] : memref<1x96xf32, #tpu.memory_space<vmem>>, vector<1x96xf32>
    %31 = vector.broadcast %30 : vector<1x96xf32> to vector<8x96xf32>
    %32 = arith.addf %29, %31 : vector<8x96xf32>
    %33 = vector.extract_strided_slice %32 {offsets = [0, 0], sizes = [8, 8], strides = [1, 1]} : vector<8x96xf32> to vector<8x8xf32>
    %34 = arith.truncf %33 : vector<8x8xf32> to vector<8x8xbf16>
    %c0_15 = arith.constant 0 : index
    %c0_16 = arith.constant 0 : index
    %c0_17 = arith.constant 0 : index
    %c0_18 = arith.constant 0 : index
    %35 = vector.load %arg7[%c0_15, %c0_16, %c0_17, %c0_18] : memref<1x4x8x8xbf16, #tpu.memory_space<vmem>>, vector<1x1x8x8xbf16>
    %36 = vector.shape_cast %35 : vector<1x1x8x8xbf16> to vector<8x8xbf16>
    %37 = vector.shape_cast %34 : vector<8x8xbf16> to vector<1x1x8x8xbf16>
    tpu.vector_store %arg7[%c0_15, %c0_16, %c0_17, %c0_18], %37 {strides = array<i32>} : memref<1x4x8x8xbf16, #tpu.memory_space<vmem>>, vector<1x1x8x8xbf16>,
    %38 = vector.extract_strided_slice %32 {offsets = [0, 32], sizes = [8, 8], strides = [1, 1]} : vector<8x96xf32> to vector<8x8xf32>
    %39 = arith.truncf %38 : vector<8x8xf32> to vector<8x8xbf16>
    %c0_19 = arith.constant 0 : index
    %c0_20 = arith.constant 0 : index
    %c0_21 = arith.constant 0 : index
    %c0_22 = arith.constant 0 : index
    %40 = vector.load %arg8[%c0_19, %c0_20, %c0_21, %c0_22] : memref<1x4x8x8xbf16, #tpu.memory_space<vmem>>, vector<1x1x8x8xbf16>
    %41 = vector.shape_cast %40 : vector<1x1x8x8xbf16> to vector<8x8xbf16>
    %42 = vector.shape_cast %39 : vector<8x8xbf16> to vector<1x1x8x8xbf16>
    tpu.vector_store %arg8[%c0_19, %c0_20, %c0_21, %c0_22], %42 {strides = array<i32>} : memref<1x4x8x8xbf16, #tpu.memory_space<vmem>>, vector<1x1x8x8xbf16>,
    %43 = vector.extract_strided_slice %32 {offsets = [0, 64], sizes = [8, 8], strides = [1, 1]} : vector<8x96xf32> to vector<8x8xf32>
    %44 = arith.truncf %43 : vector<8x8xf32> to vector<8x8xbf16>
    %c0_23 = arith.constant 0 : index
    %c0_24 = arith.constant 0 : index
    %c0_25 = arith.constant 0 : index
    %c0_26 = arith.constant 0 : index
    %45 = vector.load %arg9[%c0_23, %c0_24, %c0_25, %c0_26] : memref<1x4x8x8xbf16, #tpu.memory_space<vmem>>, vector<1x1x8x8xbf16>
    %46 = vector.shape_cast %45 : vector<1x1x8x8xbf16> to vector<8x8xbf16>
    %47 = vector.shape_cast %44 : vector<8x8xbf16> to vector<1x1x8x8xbf16>
    tpu.vector_store %arg9[%c0_23, %c0_24, %c0_25, %c0_26], %47 {strides = array<i32>} : memref<1x4x8x8xbf16, #tpu.memory_space<vmem>>, vector<1x1x8x8xbf16>,
    %48 = vector.extract_strided_slice %32 {offsets = [0, 8], sizes = [8, 8], strides = [1, 1]} : vector<8x96xf32> to vector<8x8xf32>
    %49 = arith.truncf %48 : vector<8x8xf32> to vector<8x8xbf16>
    %c0_27 = arith.constant 0 : index
    %c1 = arith.constant 1 : index
    %c0_28 = arith.constant 0 : index
    %c0_29 = arith.constant 0 : index
    %50 = vector.load %arg7[%c0_27, %c1, %c0_28, %c0_29] : memref<1x4x8x8xbf16, #tpu.memory_space<vmem>>, vector<1x1x8x8xbf16>
    %51 = vector.shape_cast %50 : vector<1x1x8x8xbf16> to vector<8x8xbf16>
    %52 = vector.shape_cast %49 : vector<8x8xbf16> to vector<1x1x8x8xbf16>
    tpu.vector_store %arg7[%c0_27, %c1, %c0_28, %c0_29], %52 {strides = array<i32>} : memref<1x4x8x8xbf16, #tpu.memory_space<vmem>>, vector<1x1x8x8xbf16>,
    %53 = vector.extract_strided_slice %32 {offsets = [0, 40], sizes = [8, 8], strides = [1, 1]} : vector<8x96xf32> to vector<8x8xf32>
    %54 = arith.truncf %53 : vector<8x8xf32> to vector<8x8xbf16>
    %c0_30 = arith.constant 0 : index
    %c1_31 = arith.constant 1 : index
    %c0_32 = arith.constant 0 : index
    %c0_33 = arith.constant 0 : index
    %55 = vector.load %arg8[%c0_30, %c1_31, %c0_32, %c0_33] : memref<1x4x8x8xbf16, #tpu.memory_space<vmem>>, vector<1x1x8x8xbf16>
    %56 = vector.shape_cast %55 : vector<1x1x8x8xbf16> to vector<8x8xbf16>
    %57 = vector.shape_cast %54 : vector<8x8xbf16> to vector<1x1x8x8xbf16>
    tpu.vector_store %arg8[%c0_30, %c1_31, %c0_32, %c0_33], %57 {strides = array<i32>} : memref<1x4x8x8xbf16, #tpu.memory_space<vmem>>, vector<1x1x8x8xbf16>,
    %58 = vector.extract_strided_slice %32 {offsets = [0, 72], sizes = [8, 8], strides = [1, 1]} : vector<8x96xf32> to vector<8x8xf32>
    %59 = arith.truncf %58 : vector<8x8xf32> to vector<8x8xbf16>
    %c0_34 = arith.constant 0 : index
    %c1_35 = arith.constant 1 : index
    %c0_36 = arith.constant 0 : index
    %c0_37 = arith.constant 0 : index
    %60 = vector.load %arg9[%c0_34, %c1_35, %c0_36, %c0_37] : memref<1x4x8x8xbf16, #tpu.memory_space<vmem>>, vector<1x1x8x8xbf16>
    %61 = vector.shape_cast %60 : vector<1x1x8x8xbf16> to vector<8x8xbf16>
    %62 = vector.shape_cast %59 : vector<8x8xbf16> to vector<1x1x8x8xbf16>
    tpu.vector_store %arg9[%c0_34, %c1_35, %c0_36, %c0_37], %62 {strides = array<i32>} : memref<1x4x8x8xbf16, #tpu.memory_space<vmem>>, vector<1x1x8x8xbf16>,
    %63 = vector.extract_strided_slice %32 {offsets = [0, 16], sizes = [8, 8], strides = [1, 1]} : vector<8x96xf32> to vector<8x8xf32>
    %64 = arith.truncf %63 : vector<8x8xf32> to vector<8x8xbf16>
    %c0_38 = arith.constant 0 : index
    %c2 = arith.constant 2 : index
    %c0_39 = arith.constant 0 : index
    %c0_40 = arith.constant 0 : index
    %65 = vector.load %arg7[%c0_38, %c2, %c0_39, %c0_40] : memref<1x4x8x8xbf16, #tpu.memory_space<vmem>>, vector<1x1x8x8xbf16>
    %66 = vector.shape_cast %65 : vector<1x1x8x8xbf16> to vector<8x8xbf16>
    %67 = vector.shape_cast %64 : vector<8x8xbf16> to vector<1x1x8x8xbf16>
    tpu.vector_store %arg7[%c0_38, %c2, %c0_39, %c0_40], %67 {strides = array<i32>} : memref<1x4x8x8xbf16, #tpu.memory_space<vmem>>, vector<1x1x8x8xbf16>,
    %68 = vector.extract_strided_slice %32 {offsets = [0, 48], sizes = [8, 8], strides = [1, 1]} : vector<8x96xf32> to vector<8x8xf32>
    %69 = arith.truncf %68 : vector<8x8xf32> to vector<8x8xbf16>
    %c0_41 = arith.constant 0 : index
    %c2_42 = arith.constant 2 : index
    %c0_43 = arith.constant 0 : index
    %c0_44 = arith.constant 0 : index
    %70 = vector.load %arg8[%c0_41, %c2_42, %c0_43, %c0_44] : memref<1x4x8x8xbf16, #tpu.memory_space<vmem>>, vector<1x1x8x8xbf16>
    %71 = vector.shape_cast %70 : vector<1x1x8x8xbf16> to vector<8x8xbf16>
    %72 = vector.shape_cast %69 : vector<8x8xbf16> to vector<1x1x8x8xbf16>
    tpu.vector_store %arg8[%c0_41, %c2_42, %c0_43, %c0_44], %72 {strides = array<i32>} : memref<1x4x8x8xbf16, #tpu.memory_space<vmem>>, vector<1x1x8x8xbf16>,
    %73 = vector.extract_strided_slice %32 {offsets = [0, 80], sizes = [8, 8], strides = [1, 1]} : vector<8x96xf32> to vector<8x8xf32>
    %74 = arith.truncf %73 : vector<8x8xf32> to vector<8x8xbf16>
    %c0_45 = arith.constant 0 : index
    %c2_46 = arith.constant 2 : index
    %c0_47 = arith.constant 0 : index
    %c0_48 = arith.constant 0 : index
    %75 = vector.load %arg9[%c0_45, %c2_46, %c0_47, %c0_48] : memref<1x4x8x8xbf16, #tpu.memory_space<vmem>>, vector<1x1x8x8xbf16>
    %76 = vector.shape_cast %75 : vector<1x1x8x8xbf16> to vector<8x8xbf16>
    %77 = vector.shape_cast %74 : vector<8x8xbf16> to vector<1x1x8x8xbf16>
    tpu.vector_store %arg9[%c0_45, %c2_46, %c0_47, %c0_48], %77 {strides = array<i32>} : memref<1x4x8x8xbf16, #tpu.memory_space<vmem>>, vector<1x1x8x8xbf16>,
    %78 = vector.extract_strided_slice %32 {offsets = [0, 24], sizes = [8, 8], strides = [1, 1]} : vector<8x96xf32> to vector<8x8xf32>
    %79 = arith.truncf %78 : vector<8x8xf32> to vector<8x8xbf16>
    %c0_49 = arith.constant 0 : index
    %c3 = arith.constant 3 : index
    %c0_50 = arith.constant 0 : index
    %c0_51 = arith.constant 0 : index
    %80 = vector.load %arg7[%c0_49, %c3, %c0_50, %c0_51] : memref<1x4x8x8xbf16, #tpu.memory_space<vmem>>, vector<1x1x8x8xbf16>
    %81 = vector.shape_cast %80 : vector<1x1x8x8xbf16> to vector<8x8xbf16>
    %82 = vector.shape_cast %79 : vector<8x8xbf16> to vector<1x1x8x8xbf16>
    tpu.vector_store %arg7[%c0_49, %c3, %c0_50, %c0_51], %82 {strides = array<i32>} : memref<1x4x8x8xbf16, #tpu.memory_space<vmem>>, vector<1x1x8x8xbf16>,
    %83 = vector.extract_strided_slice %32 {offsets = [0, 56], sizes = [8, 8], strides = [1, 1]} : vector<8x96xf32> to vector<8x8xf32>
    %84 = arith.truncf %83 : vector<8x8xf32> to vector<8x8xbf16>
    %c0_52 = arith.constant 0 : index
    %c3_53 = arith.constant 3 : index
    %c0_54 = arith.constant 0 : index
    %c0_55 = arith.constant 0 : index
    %85 = vector.load %arg8[%c0_52, %c3_53, %c0_54, %c0_55] : memref<1x4x8x8xbf16, #tpu.memory_space<vmem>>, vector<1x1x8x8xbf16>
    %86 = vector.shape_cast %85 : vector<1x1x8x8xbf16> to vector<8x8xbf16>
    %87 = vector.shape_cast %84 : vector<8x8xbf16> to vector<1x1x8x8xbf16>
    tpu.vector_store %arg8[%c0_52, %c3_53, %c0_54, %c0_55], %87 {strides = array<i32>} : memref<1x4x8x8xbf16, #tpu.memory_space<vmem>>, vector<1x1x8x8xbf16>,
    %88 = vector.extract_strided_slice %32 {offsets = [0, 88], sizes = [8, 8], strides = [1, 1]} : vector<8x96xf32> to vector<8x8xf32>
    %89 = arith.truncf %88 : vector<8x8xf32> to vector<8x8xbf16>
    %c0_56 = arith.constant 0 : index
    %c3_57 = arith.constant 3 : index
    %c0_58 = arith.constant 0 : index
    %c0_59 = arith.constant 0 : index
    %90 = vector.load %arg9[%c0_56, %c3_57, %c0_58, %c0_59] : memref<1x4x8x8xbf16, #tpu.memory_space<vmem>>, vector<1x1x8x8xbf16>
    %91 = vector.shape_cast %90 : vector<1x1x8x8xbf16> to vector<8x8xbf16>
    %92 = vector.shape_cast %89 : vector<8x8xbf16> to vector<1x1x8x8xbf16>
    tpu.vector_store %arg9[%c0_56, %c3_57, %c0_58, %c0_59], %92 {strides = array<i32>} : memref<1x4x8x8xbf16, #tpu.memory_space<vmem>>, vector<1x1x8x8xbf16>,
    return
  }
  func.func @transform_0(%arg0: i32, %arg1: i32) -> (i32, i32, i32) {
    %c0_i32 = arith.constant 0 : i32
    %c0_i32_0 = arith.constant 0 : i32
    return %arg0, %arg1, %c0_i32 : i32, i32, i32
  }
  func.func @transform_1(%arg0: i32, %arg1: i32) -> (i32, i32) {
    %c0_i32 = arith.constant 0 : i32
    %c0_i32_0 = arith.constant 0 : i32
    %c0_i32_1 = arith.constant 0 : i32
    return %c0_i32, %c0_i32_0 : i32, i32
  }
  func.func @transform_2(%arg0: i32, %arg1: i32) -> (i32, i32) {
    %c0_i32 = arith.constant 0 : i32
    %c0_i32_0 = arith.constant 0 : i32
    %c0_i32_1 = arith.constant 0 : i32
    return %c0_i32, %c0_i32_0 : i32, i32
  }
  func.func @transform_3(%arg0: i32, %arg1: i32) -> (i32, i32) {
    %c0_i32 = arith.constant 0 : i32
    %c0_i32_0 = arith.constant 0 : i32
    %c0_i32_1 = arith.constant 0 : i32
    return %c0_i32, %c0_i32_0 : i32, i32
  }
  func.func @transform_4(%arg0: i32, %arg1: i32) -> (i32, i32) {
    %c0_i32 = arith.constant 0 : i32
    %c0_i32_0 = arith.constant 0 : i32
    %c0_i32_1 = arith.constant 0 : i32
    return %c0_i32, %c0_i32_0 : i32, i32
  }
  func.func @transform_5(%arg0: i32, %arg1: i32) -> (i32, i32, i32, i32) {
    %c0_i32 = arith.constant 0 : i32
    %c0_i32_0 = arith.constant 0 : i32
    %c0_i32_1 = arith.constant 0 : i32
    return %arg0, %c0_i32, %arg1, %c0_i32_0 : i32, i32, i32, i32
  }
  func.func @transform_6(%arg0: i32, %arg1: i32) -> (i32, i32, i32, i32) {
    %c0_i32 = arith.constant 0 : i32
    %c0_i32_0 = arith.constant 0 : i32
    %c0_i32_1 = arith.constant 0 : i32
    return %arg0, %c0_i32, %arg1, %c0_i32_0 : i32, i32, i32, i32
  }
  func.func @transform_7(%arg0: i32, %arg1: i32) -> (i32, i32, i32, i32) {
    %c0_i32 = arith.constant 0 : i32
    %c0_i32_0 = arith.constant 0 : i32
    %c0_i32_1 = arith.constant 0 : i32
    return %arg0, %c0_i32, %arg1, %c0_i32_0 : i32, i32, i32, i32
  }
}

module attributes {stable_mosaic.version = 11 : i64} {
  func.func @qkv_prepass_kernel(%arg0: i32, %arg1: i32, %arg2: memref<1x8x32xf32, #tpu.memory_space<vmem>>, %arg3: memref<1x32xf32, #tpu.memory_space<vmem>>, %arg4: memref<1x32xf32, #tpu.memory_space<vmem>>, %arg5: memref<32x96xbf16, #tpu.memory_space<vmem>>, %arg6: memref<1x96xf32, #tpu.memory_space<vmem>>, %arg7: memref<1x4x8x8xbf16, #tpu.memory_space<vmem>>, %arg8: memref<1x4x8x8xbf16, #tpu.memory_space<vmem>>, %arg9: memref<1x4x8x8xbf16, #tpu.memory_space<vmem>>) attributes {dimension_semantics = [#tpu.dimension_semantics<parallel>, #tpu.dimension_semantics<parallel>], iteration_bounds = array<i64: 2, 1>, scalar_prefetch = 0 : i64, scratch_operands = 0 : i64, tpu.core_type = #tpu.core_type<tc>, window_params = [{transform_indices = @transform_0, window_bounds = array<i64: 1, 8, 32>}, {pipeline_mode = #tpu.pipeline_mode<synchronous>, transform_indices = @transform_1, window_bounds = array<i64: 1, 32>}, {pipeline_mode = #tpu.pipeline_mode<synchronous>, transform_indices = @transform_2, window_bounds = array<i64: 1, 32>}, {pipeline_mode = #tpu.pipeline_mode<synchronous>, transform_indices = @transform_3, window_bounds = array<i64: 32, 96>}, {pipeline_mode = #tpu.pipeline_mode<synchronous>, transform_indices = @transform_4, window_bounds = array<i64: 1, 96>}, {transform_indices = @transform_5, window_bounds = array<i64: 1, 4, 8, 8>}, {transform_indices = @transform_6, window_bounds = array<i64: 1, 4, 8, 8>}, {transform_indices = @transform_7, window_bounds = array<i64: 1, 4, 8, 8>}]} {
    %c0 = arith.constant 0 : index
    %c0_0 = arith.constant 0 : index
    %c0_1 = arith.constant 0 : index
    %0 = vector.load %arg2[%c0, %c0_0, %c0_1] : memref<1x8x32xf32, #tpu.memory_space<vmem>>, vector<1x8x32xf32>
    %1 = vector.shape_cast %0 : vector<1x8x32xf32> to vector<8x32xf32>
    %c0_2 = arith.constant 0 : index
    %c0_3 = arith.constant 0 : index
    %2 = vector.load %arg3[%c0_2, %c0_3] : memref<1x32xf32, #tpu.memory_space<vmem>>, vector<1x32xf32>
    %c0_4 = arith.constant 0 : index
    %c0_5 = arith.constant 0 : index
    %3 = vector.load %arg4[%c0_4, %c0_5] : memref<1x32xf32, #tpu.memory_space<vmem>>, vector<1x32xf32>
    %cst = arith.constant dense<0.000000e+00> : vector<8xf32>
    %4 = vector.multi_reduction <add>, %1, %cst [1] : vector<8x32xf32> to vector<8xf32>
    %5 = vector.shape_cast %4 : vector<8xf32> to vector<8x1xf32>
    %cst_6 = arith.constant 3.200000e+01 : f32
    %6 = vector.broadcast %cst_6 : f32 to vector<8x1xf32>
    %7 = arith.divf %5, %6 : vector<8x1xf32>
    %8 = vector.broadcast %7 : vector<8x1xf32> to vector<8x32xf32>
    %9 = arith.subf %1, %8 : vector<8x32xf32>
    %10 = arith.mulf %9, %9 : vector<8x32xf32>
    %cst_7 = arith.constant dense<0.000000e+00> : vector<8xf32>
    %11 = vector.multi_reduction <add>, %10, %cst_7 [1] : vector<8x32xf32> to vector<8xf32>
    %12 = vector.shape_cast %11 : vector<8xf32> to vector<8x1xf32>
    %cst_8 = arith.constant 3.100000e+01 : f32
    %13 = vector.broadcast %cst_8 : f32 to vector<8x1xf32>
    %14 = arith.divf %12, %13 : vector<8x1xf32>
    %15 = math.sqrt %14 : vector<8x1xf32>
    %cst_9 = arith.constant 9.99999997E-7 : f32
    %16 = vector.broadcast %cst_9 : f32 to vector<8x1xf32>
    %17 = arith.addf %15, %16 : vector<8x1xf32>
    %18 = tpu.reciprocal %17 : vector<8x1xf32> -> vector<8x1xf32>
    %19 = vector.broadcast %7 : vector<8x1xf32> to vector<8x32xf32>
    %20 = arith.subf %1, %19 : vector<8x32xf32>
    %21 = vector.broadcast %18 : vector<8x1xf32> to vector<8x32xf32>
    %22 = arith.mulf %20, %21 : vector<8x32xf32>
    %23 = vector.broadcast %2 : vector<1x32xf32> to vector<8x32xf32>
    %24 = arith.mulf %23, %22 : vector<8x32xf32>
    %25 = vector.broadcast %3 : vector<1x32xf32> to vector<8x32xf32>
    %26 = arith.addf %24, %25 : vector<8x32xf32>
    %27 = arith.truncf %26 : vector<8x32xf32> to vector<8x32xbf16>
    %c0_10 = arith.constant 0 : index
    %c0_11 = arith.constant 0 : index
    %28 = vector.load %arg5[%c0_10, %c0_11] : memref<32x96xbf16, #tpu.memory_space<vmem>>, vector<32x96xbf16>
    %cst_12 = arith.constant dense<0.000000e+00> : vector<8x96xf32>
    %29 = tpu.matmul %27, %28, %cst_12 {dimension_numbers = #tpu.dot_dimension_numbers<[1], [0], [0], [1], [0, 0, 1, 1], [], []>} : vector<8x32xbf16>, vector<32x96xbf16>, vector<8x96xf32> -> vector<8x96xf32>
    %c0_13 = arith.constant 0 : index
    %c0_14 = arith.constant 0 : index
    %30 = vector.load %arg6[%c0_13, %c0_14] : memref<1x96xf32, #tpu.memory_space<vmem>>, vector<1x96xf32>
    %31 = vector.broadcast %30 : vector<1x96xf32> to vector<8x96xf32>
    %32 = arith.addf %29, %31 : vector<8x96xf32>
    %33 = vector.extract_strided_slice %32 {offsets = [0, 0], sizes = [8, 8], strides = [1, 1]} : vector<8x96xf32> to vector<8x8xf32>
    %34 = arith.truncf %33 : vector<8x8xf32> to vector<8x8xbf16>
    %c0_15 = arith.constant 0 : index
    %c0_16 = arith.constant 0 : index
    %c0_17 = arith.constant 0 : index
    %c0_18 = arith.constant 0 : index
    %35 = vector.load %arg7[%c0_15, %c0_16, %c0_17, %c0_18] : memref<1x4x8x8xbf16, #tpu.memory_space<vmem>>, vector<1x1x8x8xbf16>
    %36 = vector.shape_cast %35 : vector<1x1x8x8xbf16> to vector<8x8xbf16>
    %37 = vector.shape_cast %34 : vector<8x8xbf16> to vector<1x1x8x8xbf16>
    tpu.vector_store %arg7[%c0_15, %c0_16, %c0_17, %c0_18], %37 {strides = array<i32>} : memref<1x4x8x8xbf16, #tpu.memory_space<vmem>>, vector<1x1x8x8xbf16>,
    %38 = vector.extract_strided_slice %32 {offsets = [0, 32], sizes = [8, 8], strides = [1, 1]} : vector<8x96xf32> to vector<8x8xf32>
    %39 = arith.truncf %38 : vector<8x8xf32> to vector<8x8xbf16>
    %c0_19 = arith.constant 0 : index
    %c0_20 = arith.constant 0 : index
    %c0_21 = arith.constant 0 : index
    %c0_22 = arith.constant 0 : index
    %40 = vector.load %arg8[%c0_19, %c0_20, %c0_21, %c0_22] : memref<1x4x8x8xbf16, #tpu.memory_space<vmem>>, vector<1x1x8x8xbf16>
    %41 = vector.shape_cast %40 : vector<1x1x8x8xbf16> to vector<8x8xbf16>
    %42 = vector.shape_cast %39 : vector<8x8xbf16> to vector<1x1x8x8xbf16>
    tpu.vector_store %arg8[%c0_19, %c0_20, %c0_21, %c0_22], %42 {strides = array<i32>} : memref<1x4x8x8xbf16, #tpu.memory_space<vmem>>, vector<1x1x8x8xbf16>,
    %43 = vector.extract_strided_slice %32 {offsets = [0, 64], sizes = [8, 8], strides = [1, 1]} : vector<8x96xf32> to vector<8x8xf32>
    %44 = arith.truncf %43 : vector<8x8xf32> to vector<8x8xbf16>
    %c0_23 = arith.constant 0 : index
    %c0_24 = arith.constant 0 : index
    %c0_25 = arith.constant 0 : index
    %c0_26 = arith.constant 0 : index
    %45 = vector.load %arg9[%c0_23, %c0_24, %c0_25, %c0_26] : memref<1x4x8x8xbf16, #tpu.memory_space<vmem>>, vector<1x1x8x8xbf16>
    %46 = vector.shape_cast %45 : vector<1x1x8x8xbf16> to vector<8x8xbf16>
    %47 = vector.shape_cast %44 : vector<8x8xbf16> to vector<1x1x8x8xbf16>
    tpu.vector_store %arg9[%c0_23, %c0_24, %c0_25, %c0_26], %47 {strides = array<i32>} : memref<1x4x8x8xbf16, #tpu.memory_space<vmem>>, vector<1x1x8x8xbf16>,
    %48 = vector.extract_strided_slice %32 {offsets = [0, 8], sizes = [8, 8], strides = [1, 1]} : vector<8x96xf32> to vector<8x8xf32>
    %49 = arith.truncf %48 : vector<8x8xf32> to vector<8x8xbf16>
    %c0_27 = arith.constant 0 : index
    %c1 = arith.constant 1 : index
    %c0_28 = arith.constant 0 : index
    %c0_29 = arith.constant 0 : index
    %50 = vector.load %arg7[%c0_27, %c1, %c0_28, %c0_29] : memref<1x4x8x8xbf16, #tpu.memory_space<vmem>>, vector<1x1x8x8xbf16>
    %51 = vector.shape_cast %50 : vector<1x1x8x8xbf16> to vector<8x8xbf16>
    %52 = vector.shape_cast %49 : vector<8x8xbf16> to vector<1x1x8x8xbf16>
    tpu.vector_store %arg7[%c0_27, %c1, %c0_28, %c0_29], %52 {strides = array<i32>} : memref<1x4x8x8xbf16, #tpu.memory_space<vmem>>, vector<1x1x8x8xbf16>,
    %53 = vector.extract_strided_slice %32 {offsets = [0, 40], sizes = [8, 8], strides = [1, 1]} : vector<8x96xf32> to vector<8x8xf32>
    %54 = arith.truncf %53 : vector<8x8xf32> to vector<8x8xbf16>
    %c0_30 = arith.constant 0 : index
    %c1_31 = arith.constant 1 : index
    %c0_32 = arith.constant 0 : index
    %c0_33 = arith.constant 0 : index
    %55 = vector.load %arg8[%c0_30, %c1_31, %c0_32, %c0_33] : memref<1x4x8x8xbf16, #tpu.memory_space<vmem>>, vector<1x1x8x8xbf16>
    %56 = vector.shape_cast %55 : vector<1x1x8x8xbf16> to vector<8x8xbf16>
    %57 = vector.shape_cast %54 : vector<8x8xbf16> to vector<1x1x8x8xbf16>
    tpu.vector_store %arg8[%c0_30, %c1_31, %c0_32, %c0_33], %57 {strides = array<i32>} : memref<1x4x8x8xbf16, #tpu.memory_space<vmem>>, vector<1x1x8x8xbf16>,
    %58 = vector.extract_strided_slice %32 {offsets = [0, 72], sizes = [8, 8], strides = [1, 1]} : vector<8x96xf32> to vector<8x8xf32>
    %59 = arith.truncf %58 : vector<8x8xf32> to vector<8x8xbf16>
    %c0_34 = arith.constant 0 : index
    %c1_35 = arith.constant 1 : index
    %c0_36 = arith.constant 0 : index
    %c0_37 = arith.constant 0 : index
    %60 = vector.load %arg9[%c0_34, %c1_35, %c0_36, %c0_37] : memref<1x4x8x8xbf16, #tpu.memory_space<vmem>>, vector<1x1x8x8xbf16>
    %61 = vector.shape_cast %60 : vector<1x1x8x8xbf16> to vector<8x8xbf16>
    %62 = vector.shape_cast %59 : vector<8x8xbf16> to vector<1x1x8x8xbf16>
    tpu.vector_store %arg9[%c0_34, %c1_35, %c0_36, %c0_37], %62 {strides = array<i32>} : memref<1x4x8x8xbf16, #tpu.memory_space<vmem>>, vector<1x1x8x8xbf16>,
    %63 = vector.extract_strided_slice %32 {offsets = [0, 16], sizes = [8, 8], strides = [1, 1]} : vector<8x96xf32> to vector<8x8xf32>
    %64 = arith.truncf %63 : vector<8x8xf32> to vector<8x8xbf16>
    %c0_38 = arith.constant 0 : index
    %c2 = arith.constant 2 : index
    %c0_39 = arith.constant 0 : index
    %c0_40 = arith.constant 0 : index
    %65 = vector.load %arg7[%c0_38, %c2, %c0_39, %c0_40] : memref<1x4x8x8xbf16, #tpu.memory_space<vmem>>, vector<1x1x8x8xbf16>
    %66 = vector.shape_cast %65 : vector<1x1x8x8xbf16> to vector<8x8xbf16>
    %67 = vector.shape_cast %64 : vector<8x8xbf16> to vector<1x1x8x8xbf16>
    tpu.vector_store %arg7[%c0_38, %c2, %c0_39, %c0_40], %67 {strides = array<i32>} : memref<1x4x8x8xbf16, #tpu.memory_space<vmem>>, vector<1x1x8x8xbf16>,
    %68 = vector.extract_strided_slice %32 {offsets = [0, 48], sizes = [8, 8], strides = [1, 1]} : vector<8x96xf32> to vector<8x8xf32>
    %69 = arith.truncf %68 : vector<8x8xf32> to vector<8x8xbf16>
    %c0_41 = arith.constant 0 : index
    %c2_42 = arith.constant 2 : index
    %c0_43 = arith.constant 0 : index
    %c0_44 = arith.constant 0 : index
    %70 = vector.load %arg8[%c0_41, %c2_42, %c0_43, %c0_44] : memref<1x4x8x8xbf16, #tpu.memory_space<vmem>>, vector<1x1x8x8xbf16>
    %71 = vector.shape_cast %70 : vector<1x1x8x8xbf16> to vector<8x8xbf16>
    %72 = vector.shape_cast %69 : vector<8x8xbf16> to vector<1x1x8x8xbf16>
    tpu.vector_store %arg8[%c0_41, %c2_42, %c0_43, %c0_44], %72 {strides = array<i32>} : memref<1x4x8x8xbf16, #tpu.memory_space<vmem>>, vector<1x1x8x8xbf16>,
    %73 = vector.extract_strided_slice %32 {offsets = [0, 80], sizes = [8, 8], strides = [1, 1]} : vector<8x96xf32> to vector<8x8xf32>
    %74 = arith.truncf %73 : vector<8x8xf32> to vector<8x8xbf16>
    %c0_45 = arith.constant 0 : index
    %c2_46 = arith.constant 2 : index
    %c0_47 = arith.constant 0 : index
    %c0_48 = arith.constant 0 : index
    %75 = vector.load %arg9[%c0_45, %c2_46, %c0_47, %c0_48] : memref<1x4x8x8xbf16, #tpu.memory_space<vmem>>, vector<1x1x8x8xbf16>
    %76 = vector.shape_cast %75 : vector<1x1x8x8xbf16> to vector<8x8xbf16>
    %77 = vector.shape_cast %74 : vector<8x8xbf16> to vector<1x1x8x8xbf16>
    tpu.vector_store %arg9[%c0_45, %c2_46, %c0_47, %c0_48], %77 {strides = array<i32>} : memref<1x4x8x8xbf16, #tpu.memory_space<vmem>>, vector<1x1x8x8xbf16>,
    %78 = vector.extract_strided_slice %32 {offsets = [0, 24], sizes = [8, 8], strides = [1, 1]} : vector<8x96xf32> to vector<8x8xf32>
    %79 = arith.truncf %78 : vector<8x8xf32> to vector<8x8xbf16>
    %c0_49 = arith.constant 0 : index
    %c3 = arith.constant 3 : index
    %c0_50 = arith.constant 0 : index
    %c0_51 = arith.constant 0 : index
    %80 = vector.load %arg7[%c0_49, %c3, %c0_50, %c0_51] : memref<1x4x8x8xbf16, #tpu.memory_space<vmem>>, vector<1x1x8x8xbf16>
    %81 = vector.shape_cast %80 : vector<1x1x8x8xbf16> to vector<8x8xbf16>
    %82 = vector.shape_cast %79 : vector<8x8xbf16> to vector<1x1x8x8xbf16>
    tpu.vector_store %arg7[%c0_49, %c3, %c0_50, %c0_51], %82 {strides = array<i32>} : memref<1x4x8x8xbf16, #tpu.memory_space<vmem>>, vector<1x1x8x8xbf16>,
    %83 = vector.extract_strided_slice %32 {offsets = [0, 56], sizes = [8, 8], strides = [1, 1]} : vector<8x96xf32> to vector<8x8xf32>
    %84 = arith.truncf %83 : vector<8x8xf32> to vector<8x8xbf16>
    %c0_52 = arith.constant 0 : index
    %c3_53 = arith.constant 3 : index
    %c0_54 = arith.constant 0 : index
    %c0_55 = arith.constant 0 : index
    %85 = vector.load %arg8[%c0_52, %c3_53, %c0_54, %c0_55] : memref<1x4x8x8xbf16, #tpu.memory_space<vmem>>, vector<1x1x8x8xbf16>
    %86 = vector.shape_cast %85 : vector<1x1x8x8xbf16> to vector<8x8xbf16>
    %87 = vector.shape_cast %84 : vector<8x8xbf16> to vector<1x1x8x8xbf16>
    tpu.vector_store %arg8[%c0_52, %c3_53, %c0_54, %c0_55], %87 {strides = array<i32>} : memref<1x4x8x8xbf16, #tpu.memory_space<vmem>>, vector<1x1x8x8xbf16>,
    %88 = vector.extract_strided_slice %32 {offsets = [0, 88], sizes = [8, 8], strides = [1, 1]} : vector<8x96xf32> to vector<8x8xf32>
    %89 = arith.truncf %88 : vector<8x8xf32> to vector<8x8xbf16>
    %c0_56 = arith.constant 0 : index
    %c3_57 = arith.constant 3 : index
    %c0_58 = arith.constant 0 : index
    %c0_59 = arith.constant 0 : index
    %90 = vector.load %arg9[%c0_56, %c3_57, %c0_58, %c0_59] : memref<1x4x8x8xbf16, #tpu.memory_space<vmem>>, vector<1x1x8x8xbf16>
    %91 = vector.shape_cast %90 : vector<1x1x8x8xbf16> to vector<8x8xbf16>
    %92 = vector.shape_cast %89 : vector<8x8xbf16> to vector<1x1x8x8xbf16>
    tpu.vector_store %arg9[%c0_56, %c3_57, %c0_58, %c0_59], %92 {strides = array<i32>} : memref<1x4x8x8xbf16, #tpu.memory_space<vmem>>, vector<1x1x8x8xbf16>,
    return
  }
  func.func @transform_0(%arg0: i32, %arg1: i32) -> (i32, i32, i32) {
    %c0_i32 = arith.constant 0 : i32
    %c0_i32_0 = arith.constant 0 : i32
    return %arg0, %arg1, %c0_i32 : i32, i32, i32
  }
  func.func @transform_1(%arg0: i32, %arg1: i32) -> (i32, i32) {
    %c0_i32 = arith.constant 0 : i32
    %c0_i32_0 = arith.constant 0 : i32
    %c0_i32_1 = arith.constant 0 : i32
    return %c0_i32, %c0_i32_0 : i32, i32
  }
  func.func @transform_2(%arg0: i32, %arg1: i32) -> (i32, i32) {
    %c0_i32 = arith.constant 0 : i32
    %c0_i32_0 = arith.constant 0 : i32
    %c0_i32_1 = arith.constant 0 : i32
    return %c0_i32, %c0_i32_0 : i32, i32
  }
  func.func @transform_3(%arg0: i32, %arg1: i32) -> (i32, i32) {
    %c0_i32 = arith.constant 0 : i32
    %c0_i32_0 = arith.constant 0 : i32
    %c0_i32_1 = arith.constant 0 : i32
    return %c0_i32, %c0_i32_0 : i32, i32
  }
  func.func @transform_4(%arg0: i32, %arg1: i32) -> (i32, i32) {
    %c0_i32 = arith.constant 0 : i32
    %c0_i32_0 = arith.constant 0 : i32
    %c0_i32_1 = arith.constant 0 : i32
    return %c0_i32, %c0_i32_0 : i32, i32
  }
  func.func @transform_5(%arg0: i32, %arg1: i32) -> (i32, i32, i32, i32) {
    %c0_i32 = arith.constant 0 : i32
    %c0_i32_0 = arith.constant 0 : i32
    %c0_i32_1 = arith.constant 0 : i32
    return %arg0, %c0_i32, %arg1, %c0_i32_0 : i32, i32, i32, i32
  }
  func.func @transform_6(%arg0: i32, %arg1: i32) -> (i32, i32, i32, i32) {
    %c0_i32 = arith.constant 0 : i32
    %c0_i32_0 = arith.constant 0 : i32
    %c0_i32_1 = arith.constant 0 : i32
    return %arg0, %c0_i32, %arg1, %c0_i32_0 : i32, i32, i32, i32
  }
  func.func @transform_7(%arg0: i32, %arg1: i32) -> (i32, i32, i32, i32) {
    %c0_i32 = arith.constant 0 : i32
    %c0_i32_0 = arith.constant 0 : i32
    %c0_i32_1 = arith.constant 0 : i32
    return %arg0, %c0_i32, %arg1, %c0_i32_0 : i32, i32, i32, i32
  }
}

</mosaic_0001>

<bundles_post_ra>
// kernel: tpu_custom_call.1
= control target key start
LH: loop header
LB: loop body
LE: loop exit
PB: predicated region body
PF: predicated region fallthrough
CT: control target
= control target key end

     0   :  { %s1462_s0 = inlined_call_operand.hbm [shape: f32[2,8,32], index: 0, kind: input, shape index: {}]   ;;  %s1463_s1 = inlined_call_operand.hbm [shape: f32[1,32], index: 1, kind: input, shape index: {}]   ;;  %s1464_s2 = inlined_call_operand.vmem [shape: f32[1,32], index: 2, kind: input, shape index: {}]   ;;  %s1465_s3 = inlined_call_operand.hbm [shape: bf16[32,96], index: 3, kind: input, shape index: {}]   ;;  %s1466_s4 = inlined_call_operand.vmem [shape: f32[1,96], index: 4, kind: input, shape index: {}]   ;;  %s1467_s5 = inlined_call_operand.hbm [shape: bf16[2,4,8,8], index: 5, kind: output, shape index: {0}]   ;;  %s1468_s6 = inlined_call_operand.hbm [shape: bf16[2,4,8,8], index: 6, kind: output, shape index: {1}]   ;;  %s1469_s7 = inlined_call_operand.hbm [shape: bf16[2,4,8,8], index: 7, kind: output, shape index: {2}]  }
   0x1   :  { %1473 = sst [smem:[#allocation16_spill]] %s1462_s0 }
   0x2   :  { %1474 = sst [smem:[#allocation17_spill]] %s1463_s1 }
   0x3   :  { %1475 = sst [smem:[#allocation18_spill]] %s1464_s2 }
   0x4   :  { %1476 = sst [smem:[#allocation19_spill]] %s1465_s3 }
   0x5   :  { %13 = vsyncpa [#allocation3], 0 }
   0x6   :  { %15 = vsyncpa [#allocation3 + $0x1], 0 }
   0x7   :  { %16 = vsyncpa [#allocation6], 0 }
   0x8   :  { %17 = vsyncpa [#allocation4], 0 }
   0x9   :  { %19 = vsyncpa [#allocation4 + $0x1], 0 }
   0xa   :  { %20 = vsyncpa [#allocation10], 0 }
   0xb   :  { %22 = vsyncpa [#allocation10 + $0x1], 0  ;;  %s1223_s24 = smov 0   ;;  %s1225_s25 = smov 0  }
   0xc   :  { %s1227_s26 = smov 0   ;;  %s1229_s27 = smov 0  }
   0xd   :  { %s1231_s28 = smov 0   ;;  %s1233_s29 = smov 0  }
   0xe LB: > { %s1254_s30 = sadd.s32 4294967295, %s1163_s29   ;;  %s1470_s8 = sadd.s32 4294967294, %s1163_s29   ;;  %s1163_s29 = sphi %s1233_s29, %s28_s29   ;;  %s1159_s28 = sphi %s1231_s28, %s1491_s28   ;;  %s1155_s27 = sphi %s1229_s27, %s1490_s27   ;;  %s1151_s26 = sphi %s1227_s26, %s1489_s26   ;;  %s1147_s25 = sphi %s1225_s25, %s1488_s25   ;;  %s1143_s24 = sphi %s1223_s24, %s1487_s24  }
   0xf   : > { %p62_p0 = scmp.ne.s32.totalorder %s1147_s25, %s1143_s24  ;;  %p63_p1 = scmp.eq.s32.totalorder %s1254_s30, 0 }
  0x10   : > { %p178_p2 = scmp.eq.s32.totalorder %s1470_s8, 1  ;;  %p760_p4 = scmp.ge.s32.totalorder %s1163_s29, 1 }
  0x11   : > { %p1264_p3 = por %p63_p1, %p62_p0  ;;  %p241_p6 = scmp.lt.s32.totalorder %s1163_s29, 3 }
  0x12   : > { %p1269_p5 = por %p178_p2, %p62_p0  ;;  %s1479_s1 = sld [smem:[#allocation17_spill]] }
  0x13   : > { %p1277_p7 = pnand %p760_p4, %p241_p6  ;;  %p763_p8 = scmp.ge.s32.totalorder %s1163_s29, 2 }
  0x14   : > { %s1165_s15 = smov [#allocation5]   ;;  %s1481_s3 = sld [smem:[#allocation19_spill]] }
  0x15   : > { %p823_p9 = pneg %p1277_p7  ;;  %s255_s16 = sshll.u32 %s1165_s15, 4  ;;  %s256_s16 = int_to_ptr.vmem [resolvable:$true] %s255_s16 }
  0x16   : > { %s1166_s20 = smov [#allocation7]   ;;  %s1167_s22 = smov 64  }
  0x17   : > { %p824_p10 = pnand %p823_p9, %p63_p1  ;;  %s269_s21 = sshll.u32 %s1166_s20, 4  ;;  %s270_s21 = int_to_ptr.vmem [resolvable:$true] %s269_s21 }
  0x18   : > { %s253_s13 = sshll.u32 %s1479_s1, 4  ;;  %s1168_s23 = smov 4   ;;  %s254_s13 = int_to_ptr.hbm [resolvable:$true] %s253_s13 }
  0x19   : > { %826 = dma.hbm_to_vmem [thread:$0]  (!%p824_p10), %s254_s13, 16, %s256_s16, [#allocation6]  }
  0x1a   : > { %s267_s19 = sshll.u32 %s1481_s3, 4  ;;  %p172_p11 = scmp.eq.s32.totalorder %s1254_s30, 1  ;;  %s268_s19 = int_to_ptr.hbm [resolvable:$true] %s267_s19 }
  0x1b   : > { %829 = dma.hbm_to_vmem [thread:$0]  (!%p824_p10), %s268_s19, 256, %s270_s21, [#allocation6], %s1167_s22, %s1167_s22, %s1168_s23  }
  0x1c   : > { %s40_s11 = sadd.s32 1, %s1159_s28  ;;  %s49_s12 = sadd.s32 1, %s1151_s26 }
  0x1d   : > { %p42_p12 = scmp.ge.s32.totalorder %s40_s11, 2  ;;  %p56_p13 = scmp.ne.s32.totalorder %s1151_s26, %s1147_s25 }
  0x1e   : > { %p57_p0 = scmp.eq.s32.totalorder %s1163_s29, 0  ;;  %p846_p4 = scmp.lt.s32.totalorder %s1163_s29, 2 }
  0x1f   : > { %s1493_s11 = smov (%p42_p12, %s40_s11), 0  ;;  %p1297_p2 = por %p172_p11, %p56_p13 }
  0x20   : > { %s44_s13 = ssub.s32 %s1159_s28, %s1493_s11  ;;  %s286_s16 = sand.u32 1, %s1151_s26  }
  0x21   : > { %p47_p6 = scmp.eq.s32.totalorder %s44_s13, 0  ;;  %p58_p9 = por %p57_p0, %p56_p13 }
  0x22   : > { %s764_s17 = sshll.u32 %s286_s16, 3  ;;  %s765_s18 = sshll.u32 %s1159_s28, 3 }
  0x23   : > { %s1307_s19 = scalar_select %p47_p6, %s1151_s26, %s49_s12  }
  0x24   : > { %s1483_s0 = sld [smem:[#allocation16_spill]]  ;;  %s290_s8 = scalar_lea.vmem [#allocation2], %s764_s17 }
  0x25   : > { %s299_s1 = sshll.u32 %s290_s8, 4  ;;  %p831_p10 = pnand %p846_p4, %p58_p9  ;;  %s300_s1 = int_to_ptr.vmem [resolvable:$true] %s299_s1 }
  0x26   : > { %s287_s3 = scalar_lea.sflag [#allocation3], %s286_s16  ;;  %s1317_s12 = sand.u32 (!%p1277_p7), 1, %s1147_s25  }
  0x27   : > { %s767_s13 = sshll.u32 (!%p1277_p7), %s1317_s12, 3 }
  0x28   : > { %308 = sbr.rel (%p1277_p7) target bundleno = 628 (0x274), region = 40  ;;  %s314_s20 = scalar_lea.vmem (!%p1277_p7), [#allocation2], %s767_s13 }
  0x2a   : > { %s295_s22 = scalar_lea.hbm %s1483_s0, %s765_s18  ;;  %s311_s18 = scalar_lea.sflag (!%p1277_p7), [#allocation3], %s1317_s12 }
  0x2b   : > { %s297_s23 = sshll.u32 %s295_s22, 4  ;;  %s298_s23 = int_to_ptr.hbm [resolvable:$true] %s297_s23 }
  0x2c   : > { %833 = dma.hbm_to_vmem [thread:$0]  (!%p831_p10), %s298_s23, 128, %s300_s1, %s287_s3  }
  0x2d   : > { %1126 = dma.done.wait (%p1264_p3), %s311_s18, 128  }
  0x2e   : > { %1128 = vsyncadd (%p1264_p3), %s311_s18, 4294967168 }
  0x2f   : > { %1130 = dma.done.wait (%p63_p1), [#allocation6], 272  }
  0x30   : > { %1132 = vsyncadd (%p63_p1), [#allocation6], 4294967024  ;;  %vm370_vm0 = vcmask 261120   ;;  %v367_v0 = vld [vmem:[%s314_s20] sm:$0xff]  ;;  %v1169_v2 = vmov 32.0   ;;  %v1170_v14 = vmov 31.0  }
  0x31   : > { %v371_v1 = vsel %vm370_vm0, %v367_v0, 0.0  ;;  %919 = vrcp.f32 %v1169_v2  ;;  %v803_v19 = vld [vmem:[#allocation7 + $0x8] sm:$0xff]  ;;  %v802_v20 = vld [vmem:[#allocation7] sm:$0xff]  ;;  %v916_v45 = vld [vmem:[#allocation5] ss:$0 sm:$0xff]  ;;  %s1484_s2 = sld [smem:[#allocation18_spill]] }
  0x32   : > { %372 = vadd.xlane.f32.xlu0 %v371_v1  ;;  %921 = vrcp.f32 %v1170_v14  ;;  %461 = vmatpush.bf16.msra.mxu0 %v803_v19  ;;  %v918_v52 = vld [vmem:[%s1466_s4] ss:$0 sm:$0xff]  ;;  %s1339_s14 = sshll.u32 %s1317_s12, 4  ;;  %vm469_vm9 = vcmask 60416   ;;  %s1471_s16 = smov 64  }
  0x33   : > { %s1172_s17 = smov 80   ;;  %s1343_s21 = scalar_lea.vmem [#allocation8], %s1339_s14 }
  0x34   : > { %s1173_s22 = smov 96   ;;  %s1174_s23 = smov 72  }
  0x35   : > { %s1175_s13 = smov 88   ;;  %s1176_s18 = smov 56  }
  0x36   : > { %462 = vmatpush.bf16.msra.mxu0 %v802_v20  ;;  %s1177_s20 = smov 120   ;;  %s1178_s1 = smov 48  }
  0x37   : > { %v920_v3 = vpop.eup %919  ;;  %v917_v48 = vld [vmem:[%s1484_s2] ss:$0 sm:$0xff]  ;;  %s1179_s3 = smov 112   ;;  %s1180_s8 = smov 40  }
  0x38   : > { %v375_v4 = vmul.f32 32.0, %v920_v3  ;;  %vm379_vm1 = vweird.f32 %v920_v3  ;;  %v922_v15 = vpop.eup %921  ;;  %s1181_s9 = smov 104  }
  0x39   : > { %v388_v16 = vmul.f32 31.0, %v922_v15  ;;  %vm392_vm2 = vweird.f32 %v922_v15 }
  0x3a   : > { %v376_v5 = vsub.f32 1.0, %v375_v4 }
  0x3b   : > { %v389_v17 = vsub.f32 1.0, %v388_v16 }
  0x3c   : > { %v377_v6 = vmul.f32 %v920_v3, %v376_v5 }
  0x3d   : > { %v390_v18 = vmul.f32 %v922_v15, %v389_v17 }
  0x3e   : > { %v378_v7 = vadd.f32 %v920_v3, %v377_v6 }
  0x3f   : > { %v391_v21 = vadd.f32 %v922_v15, %v390_v18 }
  0x40   : > { %v380_v8 = vsel %vm379_vm1, %v920_v3, %v378_v7 }
  0x41   : > { %v393_v22 = vsel %vm392_vm2, %v922_v15, %v391_v21 }
  0xa5   : > { %v373_v9 = vpop.xlane.xlu0 %372 }
  0xa6   : > { %v381_v10 = vmul.f32 %v380_v8, %v373_v9 }
  0xa8   : > { %v382_v11 = vsub.f32 %v367_v0, %v381_v10 }
  0xaa   : > { %v383_v12 = vmul.f32 %v382_v11, %v382_v11 }
  0xac   : > { %v384_v13 = vsel %vm370_vm0, %v383_v12, 0.0 }
  0xad   : > { %385 = vadd.xlane.f32.xlu0 %v384_v13 }
 0x120   : > { %v386_v23 = vpop.xlane.xlu0 %385 }
 0x121   : > { %v394_v24 = vmul.f32 %v393_v22, %v386_v23 }
 0x123   : > { %923 = vrsqrt.f32 %v394_v24  ;;  %vm402_vm3 = vcmp.eq.f32.partialorder %v394_v24, inf  ;;  %v405_v32 = vand.u32 2147483648, %v394_v24  ;;  %vm404_vm4 = vcmp.eq.f32.partialorder %v394_v24, 0.0 }
 0x129   : > { %v924_v25 = vpop.eup %923 }
 0x12a   : > { %v396_v26 = vmul.f32 %v924_v25, %v394_v24 }
 0x12c   : > { %v397_v27 = vmul.f32 %v924_v25, %v396_v26 }
 0x12e   : > { %v398_v28 = vmul.f32 0.5, %v397_v27 }
 0x130   : > { %v399_v29 = vsub.f32 1.5, %v398_v28 }
 0x132   : > { %v400_v30 = vmul.f32 %v924_v25, %v399_v29 }
 0x134   : > { %v401_v31 = vmul.f32 %v400_v30, %v394_v24 }
 0x136   : > { %v403_v33 = vsel %vm402_vm3, %v394_v24, %v401_v31 }
 0x137   : > { %v406_v34 = vsel %vm404_vm4, %v405_v32, %v403_v33 }
 0x138   : > { %v407_v35 = vadd.f32 1e-06, %v406_v34 }
 0x13a   : > { %925 = vrcp.f32 %v407_v35  ;;  %v419_v39 = vand.u32 2147483648, %v407_v35  ;;  %v417_v41 = vand.u32 2147483647, %v407_v35  ;;  %vm413_vm6 = vweird.f32 %v407_v35 }
 0x13c   : > { %v420_v43 = vor.u32 1.1754944e-38, %v419_v39  ;;  %vm418_vm8 = vcmp.eq.f32.partialorder %v417_v41, 8.507059e+37 }
 0x140   : > { %v926_v36 = vpop.eup %925 }
 0x141   : > { %v409_v37 = vmul.f32 %v926_v36, %v407_v35  ;;  %vm414_vm5 = vweird.f32 %v926_v36 }
 0x142   : > { %vm415_vm7 = vmor %vm413_vm6, %vm414_vm5 }
 0x143   : > { %v410_v38 = vsub.f32 1.0, %v409_v37 }
 0x145   : > { %v411_v40 = vmul.f32 %v926_v36, %v410_v38 }
 0x147   : > { %v412_v42 = vadd.f32 %v926_v36, %v411_v40 }
 0x149   : > { %v416_v44 = vsel %vm415_vm7, %v926_v36, %v412_v42 }
 0x14a   : > { %v421_v46 = vsel %vm418_vm8, %v420_v43, %v416_v44 }
 0x14b   : > { %v422_v47 = vmul.f32 %v421_v46, %v382_v11 }
 0x14d   : > { %v426_v49 = vmul.f32 %v916_v45, %v422_v47 }
 0x14f   : > { %v430_v50 = vadd.f32 %v917_v48, %v426_v49 }
 0x151   : > { %v431_v51 = vpack.c.bf16 %v430_v50, %v430_v50 }
 0x153   : > { %781 = vmatmul.msk.bf16.vlgmr.msra.gmra.mxu0 %vm370_vm0, %v431_v51 }
 0x1d0   : > { %v464_v53 = vpop.f32.mrf.mxu0 }
 0x1d1   : > { %v465_v54 = vadd.f32 %v918_v52, %v464_v53 }
 0x1d3   : > { %v468_v55 = vpack.c.bf16 %v465_v54, %v465_v54 }
 0x1d5   : > { %476 = vrot.lane.b32.xlu0 %v468_v55, %s1471_s16  ;;  %500 = vrot.lane.b32.xlu2 %v468_v55, %s1172_s17  ;;  %470 = vst.msk [vmem:[%s1343_s21] sm:$0xf] %vm469_vm9, %v468_v55  ;;  %s358_s17 = scalar_lea.vmem [#allocation9], %s1339_s14 }
 0x1d6   : > { %472 = vrot.lane.b32.xlu1 %v468_v55, %s1173_s22  ;;  %s365_s22 = scalar_lea.vmem [#allocation11], %s1339_s14 }
 0x1d7   : > { %s585_s16 = sshll.u32 %s365_s22, 4  ;;  %s1372_s16 = int_to_ptr.vmem [resolvable:$true] %s585_s16 }
 0x1d8   : > { %v466_v56 = vpop.f32.mrf.mxu0 }
 0x1dd   : > { %515 = vrot.lane.b32.xlu2 %v468_v55, %s1174_s23  ;;  %s1353_s23 = sshll.u32 %s1155_s27, 4 }
 0x1de   : > { %485 = vrot.lane.b32.xlu1 %v468_v55, %s1175_s13  ;;  %s584_s27 = scalar_lea.hbm %s1469_s7, %s1353_s23 }
 0x1df   : > { %s1369_s0 = sshll.u32 %s584_s27, 4  ;;  %s588_s0 = int_to_ptr.hbm [resolvable:$true] %s1369_s0 }
 0x1e5   : > { %490 = vrot.lane.b32.xlu2 %v468_v55, %s1176_s18 }
 0x1e6   : > { %480 = vrot.lane.b32.xlu1 %v468_v55, %s1177_s20  ;;  %s566_s20 = scalar_lea.hbm %s1468_s6, %s1353_s23 }
 0x1ed   : > { %505 = vrot.lane.b32.xlu2 %v468_v55, %s1178_s1  ;;  %s1037_s1 = scalar_lea.hbm %s1468_s6, 32 }
 0x1ee   : > { %495 = vrot.lane.b32.xlu1 %v468_v55, %s1179_s3  ;;  %s567_s3 = sshll.u32 %s358_s17, 4  ;;  %s568_s3 = int_to_ptr.vmem [resolvable:$true] %s567_s3 }
 0x1f5   : > { %520 = vrot.lane.b32.xlu2 %v468_v55, %s1180_s8  ;;  %s530_s8 = sand.u32 1, %s1254_s30  }
 0x1f6   : > { %510 = vrot.lane.b32.xlu1 %v468_v55, %s1181_s9  ;;  %s1367_s9 = sshll.u32 %s566_s20, 4  ;;  %s1377_s30 = scalar_lea.sflag [#allocation10], %s530_s8  ;;  %s570_s9 = int_to_ptr.hbm [resolvable:$true] %s1367_s9 }
 0x1f7   : > { %s1031_s13 = sshra.s32 %s570_s9, 4  ;;  %s1032_s13 = int_to_ptr.hbm [resolvable:$true] %s1031_s13 }
 0x1f8   : > { %s1033_s18 = scalar_lea.hbm %s1032_s13, 16  ;;  %p1038_p11 = scmp.lt.s32.totalorder %s1032_s13, %s1468_s6 }
 0x1f9   : > { %p1034_p1 = scmp.ne.s32.totalorder %s1032_s13, %s1033_s18  ;;  %p1039_p12 = scmp.lt.s32.totalorder %s1037_s1, %s1033_s18 }
 0x1fb   : > { %p1035_p3 = pnand %p1034_p1, %p1297_p2  ;;  %p1040_p13 = por %p1039_p12, %p1038_p11 }
 0x1fd   : > { %p1036_p7 = pneg %p1035_p3 }
 0x1ff   : > { %p1041_p0 = pnand %p1040_p13, %p1036_p7 }
 0x22f   : > { %v501_v57 = vpop.permute.xlu2 %500 }
 0x230   : > { %786 = vst.msk [vmem:[%s358_s17 + $0x8] sm:$0xf] %vm469_vm9, %v501_v57 }
 0x237   : > { %v516_v58 = vpop.permute.xlu2 %515 }
 0x238   : > { %789 = vst.msk [vmem:[%s358_s17 + $0xc] sm:$0xf] %vm469_vm9, %v516_v58 }
 0x23f   : > { %v491_v59 = vpop.permute.xlu2 %490 }
 0x240   : > { %784 = vst.msk [vmem:[%s365_s22 + $0x4] sm:$0xf] %vm469_vm9, %v491_v59 }
 0x247   : > { %v477_v60 = vpop.permute.xlu0 %476  ;;  %v506_v61 = vpop.permute.xlu2 %505 }
 0x248   : > { %479 = vst.msk [vmem:[%s365_s22] sm:$0xf] %vm469_vm9, %v477_v60  ;;  %v473_v62 = vpop.permute.xlu1 %472 }
 0x249   : > { %787 = vst.msk [vmem:[%s365_s22 + $0x8] sm:$0xf] %vm469_vm9, %v506_v61 }
 0x24a   : > { %475 = vst.msk [vmem:[%s358_s17] sm:$0xf] %vm469_vm9, %v473_v62 }
 0x24f   : > { %v521_v63 = vpop.permute.xlu2 %520 }
 0x250   : > { %790 = vst.msk [vmem:[%s365_s22 + $0xc] sm:$0xf] %vm469_vm9, %v521_v63  ;;  %v486_v0 = vpop.permute.xlu1 %485 }
 0x251   : > { %783 = vst.msk [vmem:[%s358_s17 + $0x4] sm:$0xf] %vm469_vm9, %v486_v0 }
 0x252   : > { %1044 = shalt.err (!%p1041_p0)
}
 0x253   : > { %s1182_s17 = smov 4   ;;  %s1485_s22 = smov 64  }
 0x254   : > { %818 = dma.vmem_to_hbm [thread:$0]  (%p1297_p2), %s568_s3, 256, %s570_s9, %s1377_s30, %s1485_s22, %s1485_s22, %s1182_s17  }
 0x255   : > { %s1059_s8 = sshra.s32 %s588_s0, 4  ;;  %s1065_s18 = scalar_lea.hbm %s1469_s7, 32  ;;  %s1060_s8 = int_to_ptr.hbm [resolvable:$true] %s1059_s8 }
 0x256   : > { %s1061_s20 = scalar_lea.hbm %s1060_s8, 16  ;;  %p1066_p10 = scmp.lt.s32.totalorder %s1060_s8, %s1469_s7 }
 0x257   : > { %p1062_p4 = scmp.ne.s32.totalorder %s1060_s8, %s1061_s20  ;;  %p1067_p1 = scmp.lt.s32.totalorder %s1065_s18, %s1061_s20 }
 0x259   : > { %p1063_p6 = pnand %p1062_p4, %p1297_p2  ;;  %p1068_p3 = por %p1067_p1, %p1066_p10 }
 0x25b   : > { %p1064_p9 = pneg %p1063_p6 }
 0x25d   : > { %p1069_p7 = pnand %p1068_p3, %p1064_p9 }
 0x25f   : > { %1072 = shalt.err (!%p1069_p7)
}
 0x260   : > { %819 = dma.vmem_to_hbm [thread:$0]  (%p1297_p2), %s1372_s16, 256, %s588_s0, %s1377_s30, %s1485_s22, %s1485_s22, %s1182_s17   ;;  %v481_v1 = vpop.permute.xlu1 %480 }
 0x261   : > { %782 = vst.msk [vmem:[%s1343_s21 + $0x4] sm:$0xf] %vm469_vm9, %v481_v1  ;;  %s548_s27 = scalar_lea.hbm %s1467_s5, %s1353_s23  ;;  %s549_s8 = sshll.u32 %s1343_s21, 4  ;;  %s550_s8 = int_to_ptr.vmem [resolvable:$true] %s549_s8 }
 0x262   : > { %s551_s20 = sshll.u32 %s548_s27, 4  ;;  %s526_s2 = scalar_lea.sflag [#allocation4], %s1317_s12  ;;  %s552_s20 = int_to_ptr.hbm [resolvable:$true] %s551_s20 }
 0x263   : > { %s1087_s0 = sshra.s32 %s552_s20, 4  ;;  %s1093_s18 = scalar_lea.hbm %s1467_s5, 32  ;;  %s1088_s0 = int_to_ptr.hbm [resolvable:$true] %s1087_s0 }
 0x264   : > { %s1089_s16 = scalar_lea.hbm %s1088_s0, 16  ;;  %p1094_p0 = scmp.lt.s32.totalorder %s1088_s0, %s1467_s5 }
 0x265   : > { %p1090_p11 = scmp.ne.s32.totalorder %s1088_s0, %s1089_s16  ;;  %p1095_p4 = scmp.lt.s32.totalorder %s1093_s18, %s1089_s16 }
 0x267   : > { %p1091_p12 = pnand %p1090_p11, %p1297_p2  ;;  %p1096_p6 = por %p1095_p4, %p1094_p0 }
 0x268   : > { %v496_v2 = vpop.permute.xlu1 %495 }
 0x269   : > { %785 = vst.msk [vmem:[%s1343_s21 + $0x8] sm:$0xf] %vm469_vm9, %v496_v2  ;;  %p1092_p13 = pneg %p1091_p12 }
 0x26b   : > { %p1097_p9 = pnand %p1096_p6, %p1092_p13 }
 0x270   : > { %v511_v3 = vpop.permute.xlu1 %510 }
 0x271   : > { %788 = vst.msk [vmem:[%s1343_s21 + $0xc] sm:$0xf] %vm469_vm9, %v511_v3 }
 0x272   : > { %1100 = shalt.err (!%p1097_p9)
}
 0x273   : > { %817 = dma.vmem_to_hbm [thread:$0]  (%p1297_p2), %s550_s8, 256, %s552_s20, %s526_s2, %s1485_s22, %s1485_s22, %s1182_s17  }
 0x274 PF: > { %s602_s12 = sand.u32 1, %s1143_s24   ;;  %p835_p10 = pnand %p763_p8, %p1269_p5 }
 0x275   : > { %s603_s21 = scalar_lea.sflag [#allocation4], %s602_s12 }
 0x276   : > { %p836_p1 = pneg %p835_p10 }
 0x278   : > { %1134 = dma.done.wait (%p836_p1), %s603_s21, 256  }
 0x279   : > { %1136 = vsyncadd (%p836_p1), %s603_s21, 4294967040  ;;  %s1486_s1 = sadd.s32 4294967294, %s1163_s29  }
 0x27a   : > { %s612_s3 = sand.u32 1, %s1486_s1  }
 0x27b   : > { %s613_s15 = scalar_lea.sflag [#allocation10], %s612_s3 }
 0x27c   : > { %1138 = dma.done.wait (%p836_p1), %s613_s15, 512  }
 0x27d   : > { %1140 = vsyncadd (%p836_p1), %s613_s15, 4294966784  ;;  %s28_s29 = sadd.s32 1, %s1163_s29   ;;  %s1487_s24 = smov %s1147_s25 }
 0x27e   : > { %p25_p2 = scmp.ge.s32.totalorder %s28_s29, 4   ;;  %s1488_s25 = smov %s1151_s26 }
 0x27f   : > { %s1489_s26 = smov %s1307_s19  ;;  %s1490_s27 = smov %s1159_s28 }
 0x280   : > { %s1491_s28 = smov %s1493_s11  ;;  %27 = sbr.rel (!%p25_p2) target bundleno = 14 (0xe), region = 134 }
 0x285   :  { %629 = vsyncpa [#allocation3], 1 }
 0x286   :  { %631 = vsyncpa [#allocation3 + $0x1], 1 }
 0x287   :  { %632 = vsyncpa [#allocation6], 1 }
 0x288   :  { %633 = vsyncpa [#allocation4], 1 }
 0x289   :  { %635 = vsyncpa [#allocation4 + $0x1], 1 }
 0x28a   :  { %636 = vsyncpa [#allocation10], 1 }
 0x28b   :  { %638 = vsyncpa [#allocation10 + $0x1], 1 }

// kernel: tpu_custom_call.1
= control target key start
LH: loop header
LB: loop body
LE: loop exit
PB: predicated region body
PF: predicated region fallthrough
CT: control target
= control target key end

     0   :  { %s1462_s0 = inlined_call_operand.hbm [shape: f32[2,8,32], index: 0, kind: input, shape index: {}]   ;;  %s1463_s1 = inlined_call_operand.hbm [shape: f32[1,32], index: 1, kind: input, shape index: {}]   ;;  %s1464_s2 = inlined_call_operand.vmem [shape: f32[1,32], index: 2, kind: input, shape index: {}]   ;;  %s1465_s3 = inlined_call_operand.hbm [shape: bf16[32,96], index: 3, kind: input, shape index: {}]   ;;  %s1466_s4 = inlined_call_operand.vmem [shape: f32[1,96], index: 4, kind: input, shape index: {}]   ;;  %s1467_s5 = inlined_call_operand.hbm [shape: bf16[2,4,8,8], index: 5, kind: output, shape index: {0}]   ;;  %s1468_s6 = inlined_call_operand.hbm [shape: bf16[2,4,8,8], index: 6, kind: output, shape index: {1}]   ;;  %s1469_s7 = inlined_call_operand.hbm [shape: bf16[2,4,8,8], index: 7, kind: output, shape index: {2}]  }
   0x1   :  { %1473 = sst [smem:[#allocation16_spill]] %s1462_s0 }
   0x2   :  { %1474 = sst [smem:[#allocation17_spill]] %s1463_s1 }
   0x3   :  { %1475 = sst [smem:[#allocation18_spill]] %s1464_s2 }
   0x4   :  { %1476 = sst [smem:[#allocation19_spill]] %s1465_s3 }
   0x5   :  { %13 = vsyncpa [#allocation3], 0 }
   0x6   :  { %15 = vsyncpa [#allocation3 + $0x1], 0 }
   0x7   :  { %16 = vsyncpa [#allocation6], 0 }
   0x8   :  { %17 = vsyncpa [#allocation4], 0 }
   0x9   :  { %19 = vsyncpa [#allocation4 + $0x1], 0 }
   0xa   :  { %20 = vsyncpa [#allocation10], 0 }
   0xb   :  { %22 = vsyncpa [#allocation10 + $0x1], 0  ;;  %s1223_s24 = smov 0   ;;  %s1225_s25 = smov 0  }
   0xc   :  { %s1227_s26 = smov 0   ;;  %s1229_s27 = smov 0  }
   0xd   :  { %s1231_s28 = smov 0   ;;  %s1233_s29 = smov 0  }
   0xe LB: > { %s1254_s30 = sadd.s32 4294967295, %s1163_s29   ;;  %s1470_s8 = sadd.s32 4294967294, %s1163_s29   ;;  %s1163_s29 = sphi %s1233_s29, %s28_s29   ;;  %s1159_s28 = sphi %s1231_s28, %s1491_s28   ;;  %s1155_s27 = sphi %s1229_s27, %s1490_s27   ;;  %s1151_s26 = sphi %s1227_s26, %s1489_s26   ;;  %s1147_s25 = sphi %s1225_s25, %s1488_s25   ;;  %s1143_s24 = sphi %s1223_s24, %s1487_s24  }
   0xf   : > { %p62_p0 = scmp.ne.s32.totalorder %s1147_s25, %s1143_s24  ;;  %p63_p1 = scmp.eq.s32.totalorder %s1254_s30, 0 }
  0x10   : > { %p178_p2 = scmp.eq.s32.totalorder %s1470_s8, 1  ;;  %p760_p4 = scmp.ge.s32.totalorder %s1163_s29, 1 }
  0x11   : > { %p1264_p3 = por %p63_p1, %p62_p0  ;;  %p241_p6 = scmp.lt.s32.totalorder %s1163_s29, 3 }
  0x12   : > { %p1269_p5 = por %p178_p2, %p62_p0  ;;  %s1479_s1 = sld [smem:[#allocation17_spill]] }
  0x13   : > { %p1277_p7 = pnand %p760_p4, %p241_p6  ;;  %p763_p8 = scmp.ge.s32.totalorder %s1163_s29, 2 }
  0x14   : > { %s1165_s15 = smov [#allocation5]   ;;  %s1481_s3 = sld [smem:[#allocation19_spill]] }
  0x15   : > { %p823_p9 = pneg %p1277_p7  ;;  %s255_s16 = sshll.u32 %s1165_s15, 4  ;;  %s256_s16 = int_to_ptr.vmem [resolvable:$true] %s255_s16 }
  0x16   : > { %s1166_s20 = smov [#allocation7]   ;;  %s1167_s22 = smov 64  }
  0x17   : > { %p824_p10 = pnand %p823_p9, %p63_p1  ;;  %s269_s21 = sshll.u32 %s1166_s20, 4  ;;  %s270_s21 = int_to_ptr.vmem [resolvable:$true] %s269_s21 }
  0x18   : > { %s253_s13 = sshll.u32 %s1479_s1, 4  ;;  %s1168_s23 = smov 4   ;;  %s254_s13 = int_to_ptr.hbm [resolvable:$true] %s253_s13 }
  0x19   : > { %826 = dma.hbm_to_vmem [thread:$0]  (!%p824_p10), %s254_s13, 16, %s256_s16, [#allocation6]  }
  0x1a   : > { %s267_s19 = sshll.u32 %s1481_s3, 4  ;;  %p172_p11 = scmp.eq.s32.totalorder %s1254_s30, 1  ;;  %s268_s19 = int_to_ptr.hbm [resolvable:$true] %s267_s19 }
  0x1b   : > { %829 = dma.hbm_to_vmem [thread:$0]  (!%p824_p10), %s268_s19, 256, %s270_s21, [#allocation6], %s1167_s22, %s1167_s22, %s1168_s23  }
  0x1c   : > { %s40_s11 = sadd.s32 1, %s1159_s28  ;;  %s49_s12 = sadd.s32 1, %s1151_s26 }
  0x1d   : > { %p42_p12 = scmp.ge.s32.totalorder %s40_s11, 2  ;;  %p56_p13 = scmp.ne.s32.totalorder %s1151_s26, %s1147_s25 }
  0x1e   : > { %p57_p0 = scmp.eq.s32.totalorder %s1163_s29, 0  ;;  %p846_p4 = scmp.lt.s32.totalorder %s1163_s29, 2 }
  0x1f   : > { %s1493_s11 = smov (%p42_p12, %s40_s11), 0  ;;  %p1297_p2 = por %p172_p11, %p56_p13 }
  0x20   : > { %s44_s13 = ssub.s32 %s1159_s28, %s1493_s11  ;;  %s286_s16 = sand.u32 1, %s1151_s26  }
  0x21   : > { %p47_p6 = scmp.eq.s32.totalorder %s44_s13, 0  ;;  %p58_p9 = por %p57_p0, %p56_p13 }
  0x22   : > { %s764_s17 = sshll.u32 %s286_s16, 3  ;;  %s765_s18 = sshll.u32 %s1159_s28, 3 }
  0x23   : > { %s1307_s19 = scalar_select %p47_p6, %s1151_s26, %s49_s12  }
  0x24   : > { %s1483_s0 = sld [smem:[#allocation16_spill]]  ;;  %s290_s8 = scalar_lea.vmem [#allocation2], %s764_s17 }
  0x25   : > { %s299_s1 = sshll.u32 %s290_s8, 4  ;;  %p831_p10 = pnand %p846_p4, %p58_p9  ;;  %s300_s1 = int_to_ptr.vmem [resolvable:$true] %s299_s1 }
  0x26   : > { %s287_s3 = scalar_lea.sflag [#allocation3], %s286_s16  ;;  %s1317_s12 = sand.u32 (!%p1277_p7), 1, %s1147_s25  }
  0x27   : > { %s767_s13 = sshll.u32 (!%p1277_p7), %s1317_s12, 3 }
  0x28   : > { %308 = sbr.rel (%p1277_p7) target bundleno = 628 (0x274), region = 40  ;;  %s314_s20 = scalar_lea.vmem (!%p1277_p7), [#allocation2], %s767_s13 }
  0x2a   : > { %s295_s22 = scalar_lea.hbm %s1483_s0, %s765_s18  ;;  %s311_s18 = scalar_lea.sflag (!%p1277_p7), [#allocation3], %s1317_s12 }
  0x2b   : > { %s297_s23 = sshll.u32 %s295_s22, 4  ;;  %s298_s23 = int_to_ptr.hbm [resolvable:$true] %s297_s23 }
  0x2c   : > { %833 = dma.hbm_to_vmem [thread:$0]  (!%p831_p10), %s298_s23, 128, %s300_s1, %s287_s3  }
  0x2d   : > { %1126 = dma.done.wait (%p1264_p3), %s311_s18, 128  }
  0x2e   : > { %1128 = vsyncadd (%p1264_p3), %s311_s18, 4294967168 }
  0x2f   : > { %1130 = dma.done.wait (%p63_p1), [#allocation6], 272  }
  0x30   : > { %1132 = vsyncadd (%p63_p1), [#allocation6], 4294967024  ;;  %vm370_vm0 = vcmask 261120   ;;  %v367_v0 = vld [vmem:[%s314_s20] sm:$0xff]  ;;  %v1169_v2 = vmov 32.0   ;;  %v1170_v14 = vmov 31.0  }
  0x31   : > { %v371_v1 = vsel %vm370_vm0, %v367_v0, 0.0  ;;  %919 = vrcp.f32 %v1169_v2  ;;  %v803_v19 = vld [vmem:[#allocation7 + $0x8] sm:$0xff]  ;;  %v802_v20 = vld [vmem:[#allocation7] sm:$0xff]  ;;  %v916_v45 = vld [vmem:[#allocation5] ss:$0 sm:$0xff]  ;;  %s1484_s2 = sld [smem:[#allocation18_spill]] }
  0x32   : > { %372 = vadd.xlane.f32.xlu0 %v371_v1  ;;  %921 = vrcp.f32 %v1170_v14  ;;  %461 = vmatpush.bf16.msra.mxu0 %v803_v19  ;;  %v918_v52 = vld [vmem:[%s1466_s4] ss:$0 sm:$0xff]  ;;  %s1339_s14 = sshll.u32 %s1317_s12, 4  ;;  %vm469_vm9 = vcmask 60416   ;;  %s1471_s16 = smov 64  }
  0x33   : > { %s1172_s17 = smov 80   ;;  %s1343_s21 = scalar_lea.vmem [#allocation8], %s1339_s14 }
  0x34   : > { %s1173_s22 = smov 96   ;;  %s1174_s23 = smov 72  }
  0x35   : > { %s1175_s13 = smov 88   ;;  %s1176_s18 = smov 56  }
  0x36   : > { %462 = vmatpush.bf16.msra.mxu0 %v802_v20  ;;  %s1177_s20 = smov 120   ;;  %s1178_s1 = smov 48  }
  0x37   : > { %v920_v3 = vpop.eup %919  ;;  %v917_v48 = vld [vmem:[%s1484_s2] ss:$0 sm:$0xff]  ;;  %s1179_s3 = smov 112   ;;  %s1180_s8 = smov 40  }
  0x38   : > { %v375_v4 = vmul.f32 32.0, %v920_v3  ;;  %vm379_vm1 = vweird.f32 %v920_v3  ;;  %v922_v15 = vpop.eup %921  ;;  %s1181_s9 = smov 104  }
  0x39   : > { %v388_v16 = vmul.f32 31.0, %v922_v15  ;;  %vm392_vm2 = vweird.f32 %v922_v15 }
  0x3a   : > { %v376_v5 = vsub.f32 1.0, %v375_v4 }
  0x3b   : > { %v389_v17 = vsub.f32 1.0, %v388_v16 }
  0x3c   : > { %v377_v6 = vmul.f32 %v920_v3, %v376_v5 }
  0x3d   : > { %v390_v18 = vmul.f32 %v922_v15, %v389_v17 }
  0x3e   : > { %v378_v7 = vadd.f32 %v920_v3, %v377_v6 }
  0x3f   : > { %v391_v21 = vadd.f32 %v922_v15, %v390_v18 }
  0x40   : > { %v380_v8 = vsel %vm379_vm1, %v920_v3, %v378_v7 }
  0x41   : > { %v393_v22 = vsel %vm392_vm2, %v922_v15, %v391_v21 }
  0xa5   : > { %v373_v9 = vpop.xlane.xlu0 %372 }
  0xa6   : > { %v381_v10 = vmul.f32 %v380_v8, %v373_v9 }
  0xa8   : > { %v382_v11 = vsub.f32 %v367_v0, %v381_v10 }
  0xaa   : > { %v383_v12 = vmul.f32 %v382_v11, %v382_v11 }
  0xac   : > { %v384_v13 = vsel %vm370_vm0, %v383_v12, 0.0 }
  0xad   : > { %385 = vadd.xlane.f32.xlu0 %v384_v13 }
 0x120   : > { %v386_v23 = vpop.xlane.xlu0 %385 }
 0x121   : > { %v394_v24 = vmul.f32 %v393_v22, %v386_v23 }
 0x123   : > { %923 = vrsqrt.f32 %v394_v24  ;;  %vm402_vm3 = vcmp.eq.f32.partialorder %v394_v24, inf  ;;  %v405_v32 = vand.u32 2147483648, %v394_v24  ;;  %vm404_vm4 = vcmp.eq.f32.partialorder %v394_v24, 0.0 }
 0x129   : > { %v924_v25 = vpop.eup %923 }
 0x12a   : > { %v396_v26 = vmul.f32 %v924_v25, %v394_v24 }
 0x12c   : > { %v397_v27 = vmul.f32 %v924_v25, %v396_v26 }
 0x12e   : > { %v398_v28 = vmul.f32 0.5, %v397_v27 }
 0x130   : > { %v399_v29 = vsub.f32 1.5, %v398_v28 }
 0x132   : > { %v400_v30 = vmul.f32 %v924_v25, %v399_v29 }
 0x134   : > { %v401_v31 = vmul.f32 %v400_v30, %v394_v24 }
 0x136   : > { %v403_v33 = vsel %vm402_vm3, %v394_v24, %v401_v31 }
 0x137   : > { %v406_v34 = vsel %vm404_vm4, %v405_v32, %v403_v33 }
 0x138   : > { %v407_v35 = vadd.f32 1e-06, %v406_v34 }
 0x13a   : > { %925 = vrcp.f32 %v407_v35  ;;  %v419_v39 = vand.u32 2147483648, %v407_v35  ;;  %v417_v41 = vand.u32 2147483647, %v407_v35  ;;  %vm413_vm6 = vweird.f32 %v407_v35 }
 0x13c   : > { %v420_v43 = vor.u32 1.1754944e-38, %v419_v39  ;;  %vm418_vm8 = vcmp.eq.f32.partialorder %v417_v41, 8.507059e+37 }
 0x140   : > { %v926_v36 = vpop.eup %925 }
 0x141   : > { %v409_v37 = vmul.f32 %v926_v36, %v407_v35  ;;  %vm414_vm5 = vweird.f32 %v926_v36 }
 0x142   : > { %vm415_vm7 = vmor %vm413_vm6, %vm414_vm5 }
 0x143   : > { %v410_v38 = vsub.f32 1.0, %v409_v37 }
 0x145   : > { %v411_v40 = vmul.f32 %v926_v36, %v410_v38 }
 0x147   : > { %v412_v42 = vadd.f32 %v926_v36, %v411_v40 }
 0x149   : > { %v416_v44 = vsel %vm415_vm7, %v926_v36, %v412_v42 }
 0x14a   : > { %v421_v46 = vsel %vm418_vm8, %v420_v43, %v416_v44 }
 0x14b   : > { %v422_v47 = vmul.f32 %v421_v46, %v382_v11 }
 0x14d   : > { %v426_v49 = vmul.f32 %v916_v45, %v422_v47 }
 0x14f   : > { %v430_v50 = vadd.f32 %v917_v48, %v426_v49 }
 0x151   : > { %v431_v51 = vpack.c.bf16 %v430_v50, %v430_v50 }
 0x153   : > { %781 = vmatmul.msk.bf16.vlgmr.msra.gmra.mxu0 %vm370_vm0, %v431_v51 }
 0x1d0   : > { %v464_v53 = vpop.f32.mrf.mxu0 }
 0x1d1   : > { %v465_v54 = vadd.f32 %v918_v52, %v464_v53 }
 0x1d3   : > { %v468_v55 = vpack.c.bf16 %v465_v54, %v465_v54 }
 0x1d5   : > { %476 = vrot.lane.b32.xlu0 %v468_v55, %s1471_s16  ;;  %500 = vrot.lane.b32.xlu2 %v468_v55, %s1172_s17  ;;  %470 = vst.msk [vmem:[%s1343_s21] sm:$0xf] %vm469_vm9, %v468_v55  ;;  %s358_s17 = scalar_lea.vmem [#allocation9], %s1339_s14 }
 0x1d6   : > { %472 = vrot.lane.b32.xlu1 %v468_v55, %s1173_s22  ;;  %s365_s22 = scalar_lea.vmem [#allocation11], %s1339_s14 }
 0x1d7   : > { %s585_s16 = sshll.u32 %s365_s22, 4  ;;  %s1372_s16 = int_to_ptr.vmem [resolvable:$true] %s585_s16 }
 0x1d8   : > { %v466_v56 = vpop.f32.mrf.mxu0 }
 0x1dd   : > { %515 = vrot.lane.b32.xlu2 %v468_v55, %s1174_s23  ;;  %s1353_s23 = sshll.u32 %s1155_s27, 4 }
 0x1de   : > { %485 = vrot.lane.b32.xlu1 %v468_v55, %s1175_s13  ;;  %s584_s27 = scalar_lea.hbm %s1469_s7, %s1353_s23 }
 0x1df   : > { %s1369_s0 = sshll.u32 %s584_s27, 4  ;;  %s588_s0 = int_to_ptr.hbm [resolvable:$true] %s1369_s0 }
 0x1e5   : > { %490 = vrot.lane.b32.xlu2 %v468_v55, %s1176_s18 }
 0x1e6   : > { %480 = vrot.lane.b32.xlu1 %v468_v55, %s1177_s20  ;;  %s566_s20 = scalar_lea.hbm %s1468_s6, %s1353_s23 }
 0x1ed   : > { %505 = vrot.lane.b32.xlu2 %v468_v55, %s1178_s1  ;;  %s1037_s1 = scalar_lea.hbm %s1468_s6, 32 }
 0x1ee   : > { %495 = vrot.lane.b32.xlu1 %v468_v55, %s1179_s3  ;;  %s567_s3 = sshll.u32 %s358_s17, 4  ;;  %s568_s3 = int_to_ptr.vmem [resolvable:$true] %s567_s3 }
 0x1f5   : > { %520 = vrot.lane.b32.xlu2 %v468_v55, %s1180_s8  ;;  %s530_s8 = sand.u32 1, %s1254_s30  }
 0x1f6   : > { %510 = vrot.lane.b32.xlu1 %v468_v55, %s1181_s9  ;;  %s1367_s9 = sshll.u32 %s566_s20, 4  ;;  %s1377_s30 = scalar_lea.sflag [#allocation10], %s530_s8  ;;  %s570_s9 = int_to_ptr.hbm [resolvable:$true] %s1367_s9 }
 0x1f7   : > { %s1031_s13 = sshra.s32 %s570_s9, 4  ;;  %s1032_s13 = int_to_ptr.hbm [resolvable:$true] %s1031_s13 }
 0x1f8   : > { %s1033_s18 = scalar_lea.hbm %s1032_s13, 16  ;;  %p1038_p11 = scmp.lt.s32.totalorder %s1032_s13, %s1468_s6 }
 0x1f9   : > { %p1034_p1 = scmp.ne.s32.totalorder %s1032_s13, %s1033_s18  ;;  %p1039_p12 = scmp.lt.s32.totalorder %s1037_s1, %s1033_s18 }
 0x1fb   : > { %p1035_p3 = pnand %p1034_p1, %p1297_p2  ;;  %p1040_p13 = por %p1039_p12, %p1038_p11 }
 0x1fd   : > { %p1036_p7 = pneg %p1035_p3 }
 0x1ff   : > { %p1041_p0 = pnand %p1040_p13, %p1036_p7 }
 0x22f   : > { %v501_v57 = vpop.permute.xlu2 %500 }
 0x230   : > { %786 = vst.msk [vmem:[%s358_s17 + $0x8] sm:$0xf] %vm469_vm9, %v501_v57 }
 0x237   : > { %v516_v58 = vpop.permute.xlu2 %515 }
 0x238   : > { %789 = vst.msk [vmem:[%s358_s17 + $0xc] sm:$0xf] %vm469_vm9, %v516_v58 }
 0x23f   : > { %v491_v59 = vpop.permute.xlu2 %490 }
 0x240   : > { %784 = vst.msk [vmem:[%s365_s22 + $0x4] sm:$0xf] %vm469_vm9, %v491_v59 }
 0x247   : > { %v477_v60 = vpop.permute.xlu0 %476  ;;  %v506_v61 = vpop.permute.xlu2 %505 }
 0x248   : > { %479 = vst.msk [vmem:[%s365_s22] sm:$0xf] %vm469_vm9, %v477_v60  ;;  %v473_v62 = vpop.permute.xlu1 %472 }
 0x249   : > { %787 = vst.msk [vmem:[%s365_s22 + $0x8] sm:$0xf] %vm469_vm9, %v506_v61 }
 0x24a   : > { %475 = vst.msk [vmem:[%s358_s17] sm:$0xf] %vm469_vm9, %v473_v62 }
 0x24f   : > { %v521_v63 = vpop.permute.xlu2 %520 }
 0x250   : > { %790 = vst.msk [vmem:[%s365_s22 + $0xc] sm:$0xf] %vm469_vm9, %v521_v63  ;;  %v486_v0 = vpop.permute.xlu1 %485 }
 0x251   : > { %783 = vst.msk [vmem:[%s358_s17 + $0x4] sm:$0xf] %vm469_vm9, %v486_v0 }
 0x252   : > { %1044 = shalt.err (!%p1041_p0)
}
 0x253   : > { %s1182_s17 = smov 4   ;;  %s1485_s22 = smov 64  }
 0x254   : > { %818 = dma.vmem_to_hbm [thread:$0]  (%p1297_p2), %s568_s3, 256, %s570_s9, %s1377_s30, %s1485_s22, %s1485_s22, %s1182_s17  }
 0x255   : > { %s1059_s8 = sshra.s32 %s588_s0, 4  ;;  %s1065_s18 = scalar_lea.hbm %s1469_s7, 32  ;;  %s1060_s8 = int_to_ptr.hbm [resolvable:$true] %s1059_s8 }
 0x256   : > { %s1061_s20 = scalar_lea.hbm %s1060_s8, 16  ;;  %p1066_p10 = scmp.lt.s32.totalorder %s1060_s8, %s1469_s7 }
 0x257   : > { %p1062_p4 = scmp.ne.s32.totalorder %s1060_s8, %s1061_s20  ;;  %p1067_p1 = scmp.lt.s32.totalorder %s1065_s18, %s1061_s20 }
 0x259   : > { %p1063_p6 = pnand %p1062_p4, %p1297_p2  ;;  %p1068_p3 = por %p1067_p1, %p1066_p10 }
 0x25b   : > { %p1064_p9 = pneg %p1063_p6 }
 0x25d   : > { %p1069_p7 = pnand %p1068_p3, %p1064_p9 }
 0x25f   : > { %1072 = shalt.err (!%p1069_p7)
}
 0x260   : > { %819 = dma.vmem_to_hbm [thread:$0]  (%p1297_p2), %s1372_s16, 256, %s588_s0, %s1377_s30, %s1485_s22, %s1485_s22, %s1182_s17   ;;  %v481_v1 = vpop.permute.xlu1 %480 }
 0x261   : > { %782 = vst.msk [vmem:[%s1343_s21 + $0x4] sm:$0xf] %vm469_vm9, %v481_v1  ;;  %s548_s27 = scalar_lea.hbm %s1467_s5, %s1353_s23  ;;  %s549_s8 = sshll.u32 %s1343_s21, 4  ;;  %s550_s8 = int_to_ptr.vmem [resolvable:$true] %s549_s8 }
 0x262   : > { %s551_s20 = sshll.u32 %s548_s27, 4  ;;  %s526_s2 = scalar_lea.sflag [#allocation4], %s1317_s12  ;;  %s552_s20 = int_to_ptr.hbm [resolvable:$true] %s551_s20 }
 0x263   : > { %s1087_s0 = sshra.s32 %s552_s20, 4  ;;  %s1093_s18 = scalar_lea.hbm %s1467_s5, 32  ;;  %s1088_s0 = int_to_ptr.hbm [resolvable:$true] %s1087_s0 }
 0x264   : > { %s1089_s16 = scalar_lea.hbm %s1088_s0, 16  ;;  %p1094_p0 = scmp.lt.s32.totalorder %s1088_s0, %s1467_s5 }
 0x265   : > { %p1090_p11 = scmp.ne.s32.totalorder %s1088_s0, %s1089_s16  ;;  %p1095_p4 = scmp.lt.s32.totalorder %s1093_s18, %s1089_s16 }
 0x267   : > { %p1091_p12 = pnand %p1090_p11, %p1297_p2  ;;  %p1096_p6 = por %p1095_p4, %p1094_p0 }
 0x268   : > { %v496_v2 = vpop.permute.xlu1 %495 }
 0x269   : > { %785 = vst.msk [vmem:[%s1343_s21 + $0x8] sm:$0xf] %vm469_vm9, %v496_v2  ;;  %p1092_p13 = pneg %p1091_p12 }
 0x26b   : > { %p1097_p9 = pnand %p1096_p6, %p1092_p13 }
 0x270   : > { %v511_v3 = vpop.permute.xlu1 %510 }
 0x271   : > { %788 = vst.msk [vmem:[%s1343_s21 + $0xc] sm:$0xf] %vm469_vm9, %v511_v3 }
 0x272   : > { %1100 = shalt.err (!%p1097_p9)
}
 0x273   : > { %817 = dma.vmem_to_hbm [thread:$0]  (%p1297_p2), %s550_s8, 256, %s552_s20, %s526_s2, %s1485_s22, %s1485_s22, %s1182_s17  }
 0x274 PF: > { %s602_s12 = sand.u32 1, %s1143_s24   ;;  %p835_p10 = pnand %p763_p8, %p1269_p5 }
 0x275   : > { %s603_s21 = scalar_lea.sflag [#allocation4], %s602_s12 }
 0x276   : > { %p836_p1 = pneg %p835_p10 }
 0x278   : > { %1134 = dma.done.wait (%p836_p1), %s603_s21, 256  }
 0x279   : > { %1136 = vsyncadd (%p836_p1), %s603_s21, 4294967040  ;;  %s1486_s1 = sadd.s32 4294967294, %s1163_s29  }
 0x27a   : > { %s612_s3 = sand.u32 1, %s1486_s1  }
 0x27b   : > { %s613_s15 = scalar_lea.sflag [#allocation10], %s612_s3 }
 0x27c   : > { %1138 = dma.done.wait (%p836_p1), %s613_s15, 512  }
 0x27d   : > { %1140 = vsyncadd (%p836_p1), %s613_s15, 4294966784  ;;  %s28_s29 = sadd.s32 1, %s1163_s29   ;;  %s1487_s24 = smov %s1147_s25 }
 0x27e   : > { %p25_p2 = scmp.ge.s32.totalorder %s28_s29, 4   ;;  %s1488_s25 = smov %s1151_s26 }
 0x27f   : > { %s1489_s26 = smov %s1307_s19  ;;  %s1490_s27 = smov %s1159_s28 }
 0x280   : > { %s1491_s28 = smov %s1493_s11  ;;  %27 = sbr.rel (!%p25_p2) target bundleno = 14 (0xe), region = 134 }
 0x285   :  { %629 = vsyncpa [#allocation3], 1 }
 0x286   :  { %631 = vsyncpa [#allocation3 + $0x1], 1 }
 0x287   :  { %632 = vsyncpa [#allocation6], 1 }
 0x288   :  { %633 = vsyncpa [#allocation4], 1 }
 0x289   :  { %635 = vsyncpa [#allocation4 + $0x1], 1 }
 0x28a   :  { %636 = vsyncpa [#allocation10], 1 }
 0x28b   :  { %638 = vsyncpa [#allocation10 + $0x1], 1 }

</bundles_post_ra>
